<compile_context>
chip_gen: v7x
topology: tpu7x:2x2x1
jax: 0.10.0
libtpu: 0.0.40
codegen_flags: <defaults>
</compile_context>

<pallas_src>
import functools

import jax
import jax.numpy as jnp
from jax import lax
from jax.experimental import pallas as pl
from jax.experimental.pallas import tpu as pltpu

_LANE = 128


def _vq_kernel(x_ref, emb_ref, e2_ref, q_ref, idx_ref, sse_ref, *, n_rows):
    x = x_ref[...]                                   # (tn, Dp)  native dtype -> MXU
    emb = emb_ref[...]                               # (Kp, Dp)  resident codebook
    e2 = e2_ref[...]                                 # (1, Kp)   f32, padded cols huge
    tn, Dp = x.shape
    Kp = emb.shape[0]

    # argmin_k ||x - e_k||^2 == argmin_k (||e_k||^2 - 2 x.e_k)   (||x||^2 dropped).
    xe = lax.dot_general(x, emb, (((1,), (1,)), ((), ())),
                         preferred_element_type=jnp.float32)        # (tn, Kp)  MXU
    d2 = e2 - 2.0 * xe                                              # (tn, Kp)  f32

    # Hierarchical first-occurrence argmin over K: elementwise (VPU) pre-min across
    # the 128-lane column groups, then one cross-lane (XLU) reduce per output.
    n_grp = Kp // _LANE
    dmin_pre = d2[:, :_LANE]
    for g in range(1, n_grp):
        dmin_pre = jnp.minimum(dmin_pre, d2[:, g * _LANE:(g + 1) * _LANE])
    dmin = jnp.min(dmin_pre, axis=1, keepdims=True)                 # (tn, 1)

    iota128 = lax.broadcasted_iota(jnp.int32, (tn, _LANE), 1)
    big = jnp.int32(Kp)
    cand = None
    for g in range(n_grp):
        blk = d2[:, g * _LANE:(g + 1) * _LANE]
        c = jnp.where(blk <= dmin, iota128 + g * _LANE, big)
        cand = c if cand is None else jnp.minimum(cand, c)
    idx_col = jnp.min(cand, axis=1, keepdims=True)                  # (tn, 1) int32

    # One-hot built once (single bool->f32 cast), reused by both matmuls below.
    iotaK = lax.broadcasted_iota(jnp.int32, (tn, Kp), 1)
    onehot_f = (iotaK == idx_col).astype(jnp.float32)               # (tn, Kp)

    # Codebook gather as one-hot @ embedding (exact; MXU).
    oh = onehot_f if emb.dtype == jnp.float32 else onehot_f.astype(emb.dtype)
    q = jnp.dot(oh, emb, preferred_element_type=jnp.float32)        # (tn, Dp) f32
    q_ref[...] = q.astype(q_ref.dtype)

    # Lane-dense index output: index recovered exactly via [0..Kp) @ onehot^T
    # (no sublane->lane relayout, no 1-lane masked stores).
    k_f = lax.broadcasted_iota(jnp.int32, (1, Kp), 1).astype(jnp.float32)
    idx_row = lax.dot_general(k_f, onehot_f, (((1,), (1,)), ((), ())),
                              preferred_element_type=jnp.float32)   # (1, tn)
    idx_ref[...] = idx_row.astype(jnp.int32)[None]                  # (1, 1, tn)

    # Per-tile SSE partial via ||q - x||^2_row = ||x||^2_row + dmin_row.
    # One (tn, Dp) VPU pass (x*x) + an MXU row-reduce; independent of q so the
    # q store above can retire early.  Padded tail rows are masked out.
    xf = x.astype(jnp.float32)
    xsq = xf * xf
    ones_d = jnp.ones((1, Dp), jnp.float32)
    x2_row = lax.dot_general(ones_d, xsq, (((1,), (1,)), ((), ())),
                             preferred_element_type=jnp.float32)    # (1, tn)
    rows = pl.program_id(0) * tn + lax.broadcasted_iota(jnp.int32, (tn, 1), 0)
    dmin_valid = jnp.where(rows < n_rows, dmin, 0.0)                # (tn, 1)
    tile_sse = (jnp.sum(x2_row, axis=1, keepdims=True)
                + jnp.sum(dmin_valid, axis=0, keepdims=True))       # (1, 1)
    sse_ref[...] = tile_sse[None]                                   # (1, 1, 1)


def vector_quantizer_forward(x, embedding, commitment_cost=0.25, tn_max=512):
    """Forward of the PyTorch VectorQuantizer: returns (quantized, indices, loss)."""
    K, D = embedding.shape
    assert x.shape[-1] == D, "x must be channel-last with last dim == embedding_dim"

    orig_shape = x.shape
    flat_x = x.reshape(-1, D)
    N = flat_x.shape[0]

    # Lane-pad K and D to multiples of 128 so the distance matmul, the gather and
    # the q store are all lane-dense (no masked vst.msk partial stores).
    K_pad = pl.cdiv(K, _LANE) * _LANE
    D_pad = pl.cdiv(D, _LANE) * _LANE

    # Row tile: lane multiple, capped so (tn, K_pad) f32 intermediates stay a few
    # MiB each, no larger than the data, and >= 2 tiles when possible (v7x megacore).
    tn_cap = max(_LANE, ((4 * 1024 * 1024) // (K_pad * 4)) // _LANE * _LANE)
    tn = min(tn_max, tn_cap, pl.cdiv(N, _LANE) * _LANE)
    if N > _LANE and pl.cdiv(N, tn) < 2:
        tn = pl.cdiv(pl.cdiv(N, 2), _LANE) * _LANE
    tn = max(_LANE, min(tn, tn_max, tn_cap))
    n_tiles = pl.cdiv(N, tn)
    N_pad = n_tiles * tn

    # TODO(synk): for large, already lane-aligned inputs this pad is an extra HBM
    # pass; handle the ragged row tail fully in-kernel instead of padding.
    if N_pad != N or D_pad != D:
        flat_x = jnp.pad(flat_x, ((0, N_pad - N), (0, D_pad - D)))

    # Codebook padded to (K_pad, D_pad).  Padded rows are zero and get a huge
    # ||e||^2 so they never win the argmin; padded columns are zero so distances,
    # the gather and the error term are unchanged.
    emb_p = embedding
    if K_pad != K or D_pad != D:
        emb_p = jnp.pad(embedding, ((0, K_pad - K), (0, D_pad - D)))
    e2 = jnp.sum(emb_p.astype(jnp.float32) ** 2, axis=1)
    e2 = jnp.where(jnp.arange(K_pad) < K, e2, jnp.float32(1e30)).reshape(1, K_pad)

    # Rough VMEM budget: single-buffered codebook + e2, double-buffered x/q tiles,
    # plus the (tn, K_pad)/(tn, D_pad) f32 intermediates.  Cap under v7x physical.
    itemsize = jnp.dtype(x.dtype).itemsize
    est = ((K_pad * D_pad + K_pad) * 4
           + 2 * 2 * tn * D_pad * itemsize
           + (4 * tn * K_pad + 3 * tn * D_pad) * 4)
    vmem_limit = int(min(max(2 * est, 32 * 1024 * 1024), 56 * 1024 * 1024))

    kernel = functools.partial(_vq_kernel, n_rows=N)
    q_flat, idx3, sse3 = pl.pallas_call(
        kernel,
        out_shape=(
            jax.ShapeDtypeStruct((N_pad, D_pad), x.dtype),          # quantized (flat)
            jax.ShapeDtypeStruct((n_tiles, 1, tn), jnp.int32),      # indices, lane-dense
            jax.ShapeDtypeStruct((n_tiles, 1, 1), jnp.float32),     # per-tile SSE partial
        ),
        grid_spec=pltpu.PrefetchScalarGridSpec(
            num_scalar_prefetch=0,
            grid=(n_tiles,),
            in_specs=[
                pl.BlockSpec((tn, D_pad), lambda i: (i, 0)),
                # Constant-index residents: single-buffer (halves their VMEM).
                pl.BlockSpec((K_pad, D_pad), lambda i: (0, 0),
                             pipeline_mode=pl.Buffered(1)),
                pl.BlockSpec((1, K_pad), lambda i: (0, 0),
                             pipeline_mode=pl.Buffered(1)),
            ],
            out_specs=[
                pl.BlockSpec((tn, D_pad), lambda i: (i, 0)),
                pl.BlockSpec((1, 1, tn), lambda i: (i, 0, 0)),
                pl.BlockSpec((1, 1, 1), lambda i: (i, 0, 0)),
            ],
        ),
        compiler_params=pltpu.CompilerParams(
            # No cross-step accumulator -> independent steps -> megacore-friendly.
            dimension_semantics=("parallel",),
            vmem_limit_bytes=vmem_limit,
        ),
    )(flat_x, emb_p, e2)

    indices = idx3.reshape(-1)[:N]
    sse = jnp.maximum(jnp.sum(sse3), jnp.float32(0.0))    # clamp fp-rounding negatives
    mse = sse / jnp.float32(N * D)

    # Forward values of e_latent_loss and q_latent_loss are identical; the
    # detach()/stop_gradient distinction only matters for backward.
    loss = (1.0 + commitment_cost) * mse

    quantized = q_flat[:N, :D].reshape(orig_shape)
    # Straight-through estimator: forward value identical to `quantized`.
    quantized = x + lax.stop_gradient(quantized - x)
    return quantized, indices, loss


if __name__ == "__main__":
    # Module hyper-parameters (small, synthetic).
    num_embeddings = 64
    embedding_dim = 32
    commitment_cost = 0.25

    key = jax.random.PRNGKey(0)
    k_x, k_emb = jax.random.split(key)

    # Codebook init: uniform(-1/K, 1/K), as in the PyTorch __init__.
    embedding = jax.random.uniform(
        k_emb, (num_embeddings, embedding_dim), dtype=jnp.float32,
        minval=-1.0 / num_embeddings, maxval=1.0 / num_embeddings)

    # (B, H, W, D) channel-last input, D == embedding_dim -> 256 rows (2 row tiles).
    x = jax.random.normal(k_x, (2, 8, 16, embedding_dim), dtype=jnp.float32)

    quantized, indices, loss = vector_quantizer_forward(
        x, embedding, commitment_cost=commitment_cost)
    jax.block_until_ready((quantized, indices, loss))

    # Pure-JAX reference.  The argmin check is tie-tolerant: near-equal distances
    # may legitimately pick a different code under a different fp summation order.
    flat = x.reshape(-1, embedding_dim)
    n = flat.shape[0]
    d_ref = jnp.sum((flat[:, None, :] - embedding[None, :, :]) ** 2, axis=-1)
    best = jnp.min(d_ref, axis=1)
    picked = d_ref[jnp.arange(n), indices]
    assert indices.shape == (n,)
    assert bool(jnp.all((indices >= 0) & (indices < num_embeddings)))
    assert bool(jnp.all(picked <= best + 1e-5))            # kernel picked an optimal code
    q_from_idx = embedding[indices].reshape(x.shape)
    assert bool(jnp.allclose(quantized, q_from_idx, atol=1e-5))
    mse_ref = jnp.mean((q_from_idx - x) ** 2)
    loss_ref = (1.0 + commitment_cost) * mse_ref
    assert bool(jnp.allclose(loss, loss_ref, atol=1e-5, rtol=1e-5))
    # Exact index agreement away from fp ties.
    d_sorted = jnp.sort(d_ref, axis=1)
    clear = (d_sorted[:, 1] - d_sorted[:, 0]) > 1e-4
    idx_ref = jnp.argmin(d_ref, axis=1)
    assert bool(jnp.all(jnp.where(clear, indices == idx_ref, True)))
    print("KERNEL_OK")
</pallas_src>

<mosaic_0001>
module attributes {stable_mosaic.version = 11 : i64} {
  func.func @_vq_kernel(%arg0: i32, %arg1: memref<128x128xf32, #tpu.memory_space<vmem>>, %arg2: memref<128x128xf32, #tpu.memory_space<vmem>>, %arg3: memref<1x128xf32, #tpu.memory_space<vmem>>, %arg4: memref<128x128xf32, #tpu.memory_space<vmem>>, %arg5: memref<1x1x128xi32, #tpu.memory_space<vmem>>, %arg6: memref<1x1x1xf32, #tpu.memory_space<vmem>>) attributes {dimension_semantics = [#tpu.dimension_semantics<parallel>], iteration_bounds = array<i64: 2>, scalar_prefetch = 0 : i64, scratch_operands = 0 : i64, tpu.core_type = #tpu.core_type<tc>, window_params = [{transform_indices = @transform_0, window_bounds = array<i64: 128, 128>}, {pipeline_mode = #tpu.pipeline_mode<synchronous>, transform_indices = @transform_1, window_bounds = array<i64: 128, 128>}, {pipeline_mode = #tpu.pipeline_mode<synchronous>, transform_indices = @transform_2, window_bounds = array<i64: 1, 128>}, {transform_indices = @transform_3, window_bounds = array<i64: 128, 128>}, {transform_indices = @transform_4, window_bounds = array<i64: 1, 1, 128>}, {transform_indices = @transform_5, window_bounds = array<i64: 1, 1, 1>}]} {
    %c0 = arith.constant 0 : index
    %c0_0 = arith.constant 0 : index
    %0 = vector.load %arg1[%c0, %c0_0] : memref<128x128xf32, #tpu.memory_space<vmem>>, vector<128x128xf32>
    %c0_1 = arith.constant 0 : index
    %c0_2 = arith.constant 0 : index
    %1 = vector.load %arg2[%c0_1, %c0_2] : memref<128x128xf32, #tpu.memory_space<vmem>>, vector<128x128xf32>
    %c0_3 = arith.constant 0 : index
    %c0_4 = arith.constant 0 : index
    %2 = vector.load %arg3[%c0_3, %c0_4] : memref<1x128xf32, #tpu.memory_space<vmem>>, vector<1x128xf32>
    %cst = arith.constant dense<0.000000e+00> : vector<128x128xf32>
    %3 = tpu.matmul %0, %1, %cst {dimension_numbers = #tpu.dot_dimension_numbers<[1], [1], [0], [0], [0, 0, 1, 0], [], []>} : vector<128x128xf32>, vector<128x128xf32>, vector<128x128xf32> -> vector<128x128xf32>
    %cst_5 = arith.constant 2.000000e+00 : f32
    %4 = vector.broadcast %cst_5 : f32 to vector<128x128xf32>
    %5 = arith.mulf %4, %3 : vector<128x128xf32>
    %6 = vector.broadcast %2 : vector<1x128xf32> to vector<128x128xf32>
    %7 = arith.subf %6, %5 : vector<128x128xf32>
    %cst_6 = arith.constant dense<0x7F800000> : vector<128xf32>
    %8 = vector.multi_reduction <minimumf>, %7, %cst_6 [1] : vector<128x128xf32> to vector<128xf32>
    %9 = vector.shape_cast %8 : vector<128xf32> to vector<128x1xf32>
    %10 = tpu.iota {dimensions = array<i32: 1>} : vector<128x128xi32>
    %11 = vector.broadcast %9 : vector<128x1xf32> to vector<128x128xf32>
    %12 = arith.cmpf ole, %7, %11 : vector<128x128xf32>
    %c0_i32 = arith.constant 0 : i32
    %13 = vector.broadcast %c0_i32 : i32 to vector<128x128xi32>
    %14 = arith.addi %10, %13 : vector<128x128xi32>
    %c128_i32 = arith.constant 128 : i32
    %15 = vector.broadcast %c128_i32 : i32 to vector<128x128xi32>
    %16 = arith.select %12, %14, %15 : vector<128x128xi1>, vector<128x128xi32>
    %cst_7 = arith.constant dense<2147483647> : vector<128xi32>
    %17 = vector.multi_reduction <minsi>, %16, %cst_7 [1] : vector<128x128xi32> to vector<128xi32>
    %18 = vector.shape_cast %17 : vector<128xi32> to vector<128x1xi32>
    %19 = tpu.iota {dimensions = array<i32: 1>} : vector<128x128xi32>
    %20 = vector.broadcast %18 : vector<128x1xi32> to vector<128x128xi32>
    %21 = arith.cmpi eq, %19, %20 : vector<128x128xi32>
    %22 = arith.extui %21 : vector<128x128xi1> to vector<128x128xi32>
    %23 = arith.sitofp %22 : vector<128x128xi32> to vector<128x128xf32>
    %cst_8 = arith.constant dense<0.000000e+00> : vector<128x128xf32>
    %24 = tpu.matmul %23, %1, %cst_8 {dimension_numbers = #tpu.dot_dimension_numbers<[1], [0], [0], [1], [0, 0, 1, 1], [], []>} : vector<128x128xf32>, vector<128x128xf32>, vector<128x128xf32> -> vector<128x128xf32>
    %c0_9 = arith.constant 0 : index
    %c0_10 = arith.constant 0 : index
    %25 = vector.load %arg4[%c0_9, %c0_10] : memref<128x128xf32, #tpu.memory_space<vmem>>, vector<128x128xf32>
    tpu.vector_store %arg4[%c0_9, %c0_10], %24 {strides = array<i32>} : memref<128x128xf32, #tpu.memory_space<vmem>>, vector<128x128xf32>,
    %26 = tpu.iota {dimensions = array<i32: 1>} : vector<1x128xi32>
    %27 = arith.sitofp %26 : vector<1x128xi32> to vector<1x128xf32>
    %cst_11 = arith.constant dense<0.000000e+00> : vector<1x128xf32>
    %28 = tpu.matmul %27, %23, %cst_11 {dimension_numbers = #tpu.dot_dimension_numbers<[1], [1], [0], [0], [0, 0, 1, 0], [], []>} : vector<1x128xf32>, vector<128x128xf32>, vector<1x128xf32> -> vector<1x128xf32>
    %29 = arith.fptosi %28 : vector<1x128xf32> to vector<1x128xi32>
    %30 = vector.shape_cast %29 : vector<1x128xi32> to vector<1x1x128xi32>
    %c0_12 = arith.constant 0 : index
    %c0_13 = arith.constant 0 : index
    %c0_14 = arith.constant 0 : index
    %31 = vector.load %arg5[%c0_12, %c0_13, %c0_14] : memref<1x1x128xi32, #tpu.memory_space<vmem>>, vector<1x1x128xi32>
    tpu.vector_store %arg5[%c0_12, %c0_13, %c0_14], %30 {strides = array<i32>} : memref<1x1x128xi32, #tpu.memory_space<vmem>>, vector<1x1x128xi32>,
    %32 = arith.mulf %0, %0 : vector<128x128xf32>
    %cst_15 = arith.constant 1.000000e+00 : f32
    %33 = vector.broadcast %cst_15 : f32 to vector<1x128xf32>
    %cst_16 = arith.constant dense<0.000000e+00> : vector<1x128xf32>
    %34 = tpu.matmul %33, %32, %cst_16 {dimension_numbers = #tpu.dot_dimension_numbers<[1], [1], [0], [0], [0, 0, 1, 0], [], []>} : vector<1x128xf32>, vector<128x128xf32>, vector<1x128xf32> -> vector<1x128xf32>
    %c128_i32_17 = arith.constant 128 : i32
    %35 = arith.muli %arg0, %c128_i32_17 : i32
    %36 = tpu.iota {dimensions = array<i32: 0>} : vector<128x1xi32>
    %37 = vector.broadcast %35 : i32 to vector<128x1xi32>
    %38 = arith.addi %37, %36 : vector<128x1xi32>
    %c256_i32 = arith.constant 256 : i32
    %39 = vector.broadcast %c256_i32 : i32 to vector<128x1xi32>
    %40 = arith.cmpi slt, %38, %39 : vector<128x1xi32>
    %cst_18 = arith.constant 0.000000e+00 : f32
    %41 = vector.broadcast %cst_18 : f32 to vector<128x1xf32>
    %42 = arith.select %40, %9, %41 : vector<128x1xi1>, vector<128x1xf32>
    %cst_19 = arith.constant dense<0.000000e+00> : vector<1xf32>
    %43 = vector.multi_reduction <add>, %34, %cst_19 [1] : vector<1x128xf32> to vector<1xf32>
    %44 = vector.shape_cast %43 : vector<1xf32> to vector<1x1xf32>
    %cst_20 = arith.constant dense<0.000000e+00> : vector<1xf32>
    %45 = vector.multi_reduction <add>, %42, %cst_20 [0] : vector<128x1xf32> to vector<1xf32>
    %46 = vector.shape_cast %45 : vector<1xf32> to vector<1x1xf32>
    %47 = arith.addf %44, %46 : vector<1x1xf32>
    %48 = vector.shape_cast %47 : vector<1x1xf32> to vector<1x1x1xf32>
    %c0_21 = arith.constant 0 : index
    %c0_22 = arith.constant 0 : index
    %c0_23 = arith.constant 0 : index
    %49 = vector.load %arg6[%c0_21, %c0_22, %c0_23] : memref<1x1x1xf32, #tpu.memory_space<vmem>>, vector<1x1x1xf32>
    tpu.vector_store %arg6[%c0_21, %c0_22, %c0_23], %48 {strides = array<i32>} : memref<1x1x1xf32, #tpu.memory_space<vmem>>, vector<1x1x1xf32>,
    return
  }
  func.func @transform_0(%arg0: i32) -> (i32, i32) {
    %c0_i32 = arith.constant 0 : i32
    %c0_i32_0 = arith.constant 0 : i32
    return %arg0, %c0_i32 : i32, i32
  }
  func.func @transform_1(%arg0: i32) -> (i32, i32) {
    %c0_i32 = arith.constant 0 : i32
    %c0_i32_0 = arith.constant 0 : i32
    %c0_i32_1 = arith.constant 0 : i32
    return %c0_i32, %c0_i32_0 : i32, i32
  }
  func.func @transform_2(%arg0: i32) -> (i32, i32) {
    %c0_i32 = arith.constant 0 : i32
    %c0_i32_0 = arith.constant 0 : i32
    %c0_i32_1 = arith.constant 0 : i32
    return %c0_i32, %c0_i32_0 : i32, i32
  }
  func.func @transform_3(%arg0: i32) -> (i32, i32) {
    %c0_i32 = arith.constant 0 : i32
    %c0_i32_0 = arith.constant 0 : i32
    return %arg0, %c0_i32 : i32, i32
  }
  func.func @transform_4(%arg0: i32) -> (i32, i32, i32) {
    %c0_i32 = arith.constant 0 : i32
    %c0_i32_0 = arith.constant 0 : i32
    %c0_i32_1 = arith.constant 0 : i32
    return %arg0, %c0_i32, %c0_i32_0 : i32, i32, i32
  }
  func.func @transform_5(%arg0: i32) -> (i32, i32, i32) {
    %c0_i32 = arith.constant 0 : i32
    %c0_i32_0 = arith.constant 0 : i32
    %c0_i32_1 = arith.constant 0 : i32
    return %arg0, %c0_i32, %c0_i32_0 : i32, i32, i32
  }
}

</mosaic_0001>

<bundles_post_ra>
// kernel: tpu_custom_call.1
= control target key start
LH: loop header
LB: loop body
LE: loop exit
PB: predicated region body
PF: predicated region fallthrough
CT: control target
= control target key end

     0   :  { %11 = vsyncpa [#allocation3], 0  ;;  %s2931_s0 = inlined_call_operand.hbm [shape: f32[256,128], index: 0, kind: input, shape index: {}]   ;;  %s2932_s1 = inlined_call_operand.hbm [shape: f32[128,128], index: 1, kind: input, shape index: {}]   ;;  %s2933_s2 = inlined_call_operand.vmem [shape: f32[1,128], index: 2, kind: input, shape index: {}]   ;;  %s2934_s3 = inlined_call_operand.hbm [shape: f32[256,128], index: 3, kind: output, shape index: {0}]   ;;  %s2935_s4 = inlined_call_operand.hbm [shape: s32[2,1,128], index: 4, kind: output, shape index: {1}]   ;;  %s2936_s5 = inlined_call_operand.vmem [shape: f32[2,1,1], index: 5, kind: output, shape index: {2}]  }
   0x1   :  { %13 = vsyncpa [#allocation3 + $0x1], 0 }
   0x2   :  { %14 = vsyncpa [#allocation6], 0 }
   0x3   :  { %15 = vsyncpa [#allocation4], 0 }
   0x4   :  { %17 = vsyncpa [#allocation4 + $0x1], 0 }
   0x5   :  { %18 = vsyncpa [#allocation9], 0 }
   0x6   :  { %20 = vsyncpa [#allocation9 + $0x1], 0  ;;  %s2153_s18 = smov 0   ;;  %s2155_s19 = smov 0  }
   0x7   :  { %s2157_s20 = smov 0   ;;  %s2159_s21 = smov 0  }
   0x8 LB: > { %s2174_s22 = sadd.s32 4294967295, %s2108_s21   ;;  %s1414_s23 = sadd.s32 4294967294, %s2108_s21   ;;  %s2108_s21 = sphi %s2159_s21, %s2966_s21   ;;  %s2104_s20 = sphi %s2157_s20, %s2965_s20   ;;  %s2100_s19 = sphi %s2155_s19, %s2964_s19   ;;  %s2096_s18 = sphi %s2153_s18, %s2963_s18  }
   0x9   : > { %p46_p0 = scmp.ne.s32.totalorder %s2100_s19, %s2096_s18  ;;  %p2937_p1 = scmp.eq.s32.totalorder %s2174_s22, 0 }
   0xa   : > { %p118_p3 = scmp.eq.s32.totalorder %s1414_s23, 1  ;;  %p1415_p5 = scmp.ge.s32.totalorder %s2108_s21, 1 }
   0xb   : > { %p2183_p4 = por %p2937_p1, %p46_p0  ;;  %p177_p7 = scmp.lt.s32.totalorder %s2108_s21, 3 }
   0xc   : > { %p2188_p6 = por %p118_p3, %p46_p0  ;;  %s2110_s27 = smov [#allocation5]  }
   0xd   : > { %s2940_s24 = scalar_select %p2183_p4, 1, 0 }
   0xe   : > { %s2941_s25 = scalar_select %p2188_p6, 1, 0 }
   0xf   : > { %p2193_p8 = pnand %p1415_p5, %p177_p7  ;;  %s189_s28 = sshll.u32 %s2110_s27, 4  ;;  %s2197_s28 = int_to_ptr.vmem [resolvable:$true] %s189_s28 }
  0x10   : > { %s2209_s30 = sadd.s32 1, %s2108_s21   ;;  %s33_s6 = sadd.s32 1, %s2104_s20 }
  0x11   : > { %s2942_s26 = scalar_select %p2193_p8, 1, 0 }
  0x12   : > { %p1887_p9 = pneg %p2193_p8  ;;  %s30_s7 = ssub.s32 %s2108_s21, %s2209_s30 }
  0x13   : > { %s1948_s10 = scalar_lea.hbm %s2932_s1, 2048 }
  0x14   : > { %p2204_p11 = pnand %p1887_p9, %p2937_p1  ;;  %p1949_p12 = scmp.ne.s32.totalorder %s2932_s1, %s1948_s10 }
  0x15   : > { %p1955_p5 = scmp.lt.u32.totalorder %s1948_s10, %s2932_s1 }
  0x16   : > { %p1950_p13 = pneg %p2204_p11 }
  0x18   : > { %p1951_p0 = pnand %p1950_p13, %p1949_p12 }
  0x1a   : > { %p1952_p3 = pneg %p1951_p0 }
  0x1c   : > { %p1957_p7 = pnand %p1955_p5, %p1952_p3 }
  0x1e   : > { %1960 = shalt.err (!%p1957_p7)
}
  0x1f   : > { %s1961_s15 = scalar_lea.vmem %s2197_s28, 2048  ;;  %p1969_p2 = scmp.lt.s32.totalorder %s2197_s28, %s2197_s28 }
  0x20   : > { %p1962_p9 = scmp.ne.s32.totalorder %s2197_s28, %s1961_s15  ;;  %p1970_p6 = scmp.lt.s32.totalorder %s1961_s15, %s1961_s15 }
  0x22   : > { %p1964_p10 = pnand %p1962_p9, %p1950_p13  ;;  %p1971_p4 = por %p1970_p6, %p1969_p2 }
  0x24   : > { %p1965_p1 = pneg %p1964_p10 }
  0x26   : > { %p1972_p8 = pnand %p1971_p4, %p1965_p1 }
  0x28   : > { %1975 = shalt.err (!%p1972_p8)
}
  0x29   : > { %s2111_s16 = smov 128   ;;  %s2112_s17 = smov 8  }
  0x2a   : > { %1890 = dma.hbm_to_vmem [thread:$0]  (!%p2204_p11), %s2932_s1, 2048, %s2197_s28, [#allocation6], %s2111_s16, %s2111_s16, %s2112_s17  }
  0x2b   : > { %p31_p1 = scmp.eq.s32.totalorder %s30_s7, 0  ;;  %p40_p2 = scmp.ne.s32.totalorder %s2104_s20, %s2100_s19 }
  0x2c   : > { %p41_p4 = scmp.eq.s32.totalorder %s2108_s21, 0  ;;  %p1903_p6 = scmp.lt.s32.totalorder %s2108_s21, 2 }
  0x2d   : > { %s2243_s8 = scalar_select %p31_p1, %s2104_s20, %s33_s6  }
  0x2e   : > { %p42_p8 = por %p41_p4, %p40_p2  ;;  %p2944_p10 = scmp.eq.s32.totalorder %s2174_s22, 1 }
  0x2f   : > { %s206_s29 = sand.u32 1, %s2104_s20   ;;  %s1481_s10 = sshll.u32 %s2108_s21, 11 }
  0x30   : > { %p2247_p12 = por %p2944_p10, %p40_p2  ;;  %s1418_s11 = sshll.u32 %s206_s29, 7 }
  0x31   : > { %s2256_s14 = scalar_lea.hbm %s2931_s0, %s1481_s10  ;;  %s210_s28 = scalar_lea.vmem [#allocation2], %s1418_s11 }
  0x32   : > { %s217_s6 = sshll.u32 %s210_s28, 4  ;;  %p2258_p11 = pnand %p1903_p6, %p42_p8  ;;  %s2262_s6 = int_to_ptr.vmem [resolvable:$true] %s217_s6 }
  0x33   : > { %s2264_s15 = scalar_lea.sflag [#allocation3], %s206_s29  ;;  %s1976_s23 = scalar_lea.hbm %s2256_s14, 2048 }
  0x34   : > { %p1977_p13 = scmp.ne.s32.totalorder %s2256_s14, %s1976_s23  ;;  %p1978_p0 = pneg %p2258_p11 }
  0x35   : > { %s1981_s11 = scalar_lea.hbm %s2931_s0, 4096  ;;  %p1982_p7 = scmp.lt.u32.totalorder %s2256_s14, %s2931_s0 }
  0x36   : > { %p1979_p3 = pnand %p1978_p0, %p1977_p13  ;;  %p1983_p9 = scmp.lt.u32.totalorder %s1981_s11, %s1976_s23 }
  0x37   : > { %p1985_p2 = scmp.lt.u32.totalorder %s1976_s23, %s2256_s14 }
  0x38   : > { %p1980_p5 = pneg %p1979_p3  ;;  %p1984_p1 = por %p1983_p9, %p1982_p7 }
  0x3a   : > { %p1986_p4 = por %p1985_p2, %p1984_p1 }
  0x3c   : > { %p1987_p6 = pnand %p1986_p4, %p1980_p5 }
  0x3e   : > { %1990 = shalt.err (!%p1987_p6)
}
  0x3f   : > { %s1991_s29 = scalar_lea.vmem %s2262_s6, 2048  ;;  %s2113_s28 = smov [#allocation2]  }
  0x40   : > { %p1992_p8 = scmp.ne.s32.totalorder %s2262_s6, %s1991_s29  ;;  %s1996_s27 = sshll.u32 %s2113_s28, 4  ;;  %s1997_s27 = int_to_ptr.vmem [resolvable:$false] %s1996_s27 }
  0x41   : > { %s1998_s10 = scalar_lea.vmem %s1997_s27, 4096  ;;  %p1999_p3 = scmp.lt.s32.totalorder %s2262_s6, %s1997_s27 }
  0x42   : > { %p1994_p10 = pnand %p1992_p8, %p1978_p0  ;;  %p2000_p7 = scmp.lt.s32.totalorder %s1998_s10, %s1991_s29 }
  0x44   : > { %p1995_p13 = pneg %p1994_p10  ;;  %p2001_p9 = por %p2000_p7, %p1999_p3 }
  0x46   : > { %p2002_p1 = pnand %p2001_p9, %p1995_p13 }
  0x48   : > { %2005 = shalt.err (!%p2002_p1)
}
  0x49   : > { %1894 = dma.hbm_to_vmem [thread:$0]  (!%p2258_p11), %s2256_s14, 2048, %s2262_s6, %s2264_s15, %s2111_s16, %s2111_s16, %s2112_s17  }
  0x4a   : > { %p2947_p0 = scmp.ne.s32.totalorder %s2942_s26, 0 }
  0x4b   : > { %s2298_s23 = sand.u32 (!%p2947_p0), 1, %s2100_s19   ;;  %p2948_p5 = scmp.ne.s32.totalorder (!%p2947_p0), %s2940_s24, 0 }
  0x4c   : > { %229 = sbr.rel (%p2947_p0) target bundleno = 1109 (0x455), region = 32  ;;  %s1422_s11 = sshll.u32 (!%p2947_p0), %s2298_s23, 7 }
  0x4d   : > { %s232_s12 = scalar_lea.sflag (!%p2947_p0), [#allocation3], %s2298_s23  ;;  %s2304_s7 = scalar_lea.vmem (!%p2947_p0), [#allocation2], %s1422_s11 }
  0x53   : > { %2079 = dma.done.wait (%p2948_p5), %s232_s12, 2048  }
  0x54   : > { %2081 = vsyncadd (%p2948_p5), %s232_s12, 4294965248  ;;  %p2949_p11 = scmp.eq.s32.totalorder %s2174_s22, 0 }
  0x56   : > { %2083 = dma.done.wait (%p2949_p11), [#allocation6], 2048   ;;  %p2950_p2 = pmov %p2949_p11 }
  0x57   : > { %v294_v0 = vld [vmem:[#allocation5] sm:$0xff]  ;;  %v295_v1 = vld [vmem:[#allocation5 + $0x8] sm:$0xff]  ;;  %v296_v2 = vld [vmem:[#allocation5 + $0x10] sm:$0xff]  ;;  %v2114_v46 = vmov 0.0|0.0   ;;  %vm2115_vm0 = vmmov 0   ;;  %v2116_v47 = vmov 0.0  }
  0x58   : > { %2085 = vsyncadd (%p2950_p2), [#allocation6], 4294965248  ;;  %v1763_v3 = vpack.c.bf16 %v295_v1, %v294_v0  ;;  %v297_v4 = vld [vmem:[#allocation5 + $0x18] sm:$0xff]  ;;  %v298_v6 = vld [vmem:[#allocation5 + $0x20] sm:$0xff]  ;;  %s1474_s16 = sshll.u32 %s2174_s22, 7  ;;  %p275_p4 = scmp.lt.s32.totalorder %s2174_s22, 1 }
  0x59   : > { %v1767_v5 = vpack.c.bf16 %v297_v4, %v296_v2  ;;  %v299_v7 = vld [vmem:[#allocation5 + $0x28] sm:$0xff]  ;;  %v278_v8 = vld [vmem:[%s2304_s7] sm:$0xff]  ;;  %v280_v12 = vld [vmem:[%s2304_s7 + $0x10] sm:$0xff]  ;;  %v2117_v2 = vmov 1.0   ;;  %s2831_s13 = scalar_lea.vmem [#allocation7], %s1422_s11  ;;  %s1482_s29 = sshll.u32 %s2174_s22, 11 }
  0x5a   : > { %1764 = vmatprep.subr.bf16.mxu0 %v1763_v3  ;;  %1796 = vmatprep.subr.bf16.mxu1 %v1763_v3  ;;  %v279_v9 = vld [vmem:[%s2304_s7 + $0x8] sm:$0xff]  ;;  %v2316_v10 = vmul.f32 %v278_v8, %v278_v8  ;;  %v281_v13 = vld [vmem:[%s2304_s7 + $0x18] sm:$0xff]  ;;  %v1771_v14 = vpack.c.bf16 %v299_v7, %v298_v6  ;;  %v2322_v15 = vmul.f32 %v280_v12, %v280_v12  ;;  %v300_v17 = vld [vmem:[#allocation5 + $0x30] sm:$0xff]  ;;  %s276_s17 = scalar_select %p275_p4, %s2174_s22, 1 }
  0x5b   : > { %1766 = vmatpush3.bf16.xpose.msra.mxu0 %v1763_v3  ;;  %1798 = vmatpush3.bf16.msra.mxu1 %v1763_v3  ;;  %v2318_v11 = vmul.f32 %v279_v9, %v279_v9  ;;  %v2324_v16 = vmul.f32 %v281_v13, %v281_v13  ;;  %v301_v18 = vld [vmem:[#allocation5 + $0x38] sm:$0xff]  ;;  %v302_v22 = vld [vmem:[#allocation5 + $0x40] sm:$0xff]  ;;  %v303_v23 = vld [vmem:[#allocation5 + $0x48] sm:$0xff]  ;;  %s1268_s28 = sshll.u32 %s2831_s13, 4  ;;  %s2852_s11 = scalar_lea.hbm %s2934_s3, %s1482_s29  ;;  %s2854_s28 = int_to_ptr.vmem [resolvable:$true] %s1268_s28 }
  0x5c   : > { %1768 = vmatprep.subr.bf16.mxu0 %v1767_v5  ;;  %1800 = vmatprep.subr.bf16.mxu1 %v1767_v5  ;;  %v1775_v21 = vpack.c.bf16 %v301_v18, %v300_v17  ;;  %v1779_v24 = vpack.c.bf16 %v303_v23, %v302_v22  ;;  %v304_v25 = vld [vmem:[#allocation5 + $0x50] sm:$0xff]  ;;  %v305_v26 = vld [vmem:[#allocation5 + $0x58] sm:$0xff]  ;;  %v306_v28 = vld [vmem:[#allocation5 + $0x60] sm:$0xff]  ;;  %s277_s15 = scalar_lea.vmem %s2936_s5, %s276_s17  ;;  %s1248_s12 = scalar_lea.sflag [#allocation4], %s2298_s23 }
  0x5d   : > { %1613 = vmatprep.mubr.f32.mxu0 %v278_v8  ;;  %v1852_v19 = vpack.c.bf16 %v2318_v11, %v2316_v10  ;;  %v1855_v20 = vpack.c.bf16 %v2324_v16, %v2322_v15  ;;  %v1783_v27 = vpack.c.bf16 %v305_v26, %v304_v25  ;;  %v307_v29 = vld [vmem:[#allocation5 + $0x68] sm:$0xff]  ;;  %v308_v31 = vld [vmem:[#allocation5 + $0x70] sm:$0xff]  ;;  %v309_v32 = vld [vmem:[#allocation5 + $0x78] sm:$0xff]  ;;  %s2119_s24 = smov [#allocation7]  }
  0x5e   : > { %v1787_v30 = vpack.c.bf16 %v307_v29, %v306_v28  ;;  %v1791_v33 = vpack.c.bf16 %v309_v32, %v308_v31  ;;  %v282_v34 = vld [vmem:[%s2304_s7 + $0x20] sm:$0xff]  ;;  %v283_v35 = vld [vmem:[%s2304_s7 + $0x28] sm:$0xff]  ;;  %v284_v36 = vld [vmem:[%s2304_s7 + $0x30] sm:$0xff]  ;;  %s2010_s26 = sshll.u32 %s2119_s24, 4  ;;  %s2011_s26 = int_to_ptr.vmem [resolvable:$false] %s2010_s26 }
  0x5f   : > { %1802 = vmatpush3.bf16.msra.mxu1 %v1767_v5  ;;  %v285_v37 = vld [vmem:[%s2304_s7 + $0x38] sm:$0xff]  ;;  %v286_v38 = vld [vmem:[%s2304_s7 + $0x40] sm:$0xff]  ;;  %v287_v39 = vld [vmem:[%s2304_s7 + $0x48] sm:$0xff]  ;;  %v1070_v48 = vmul.f32 %v282_v34, %v282_v34  ;;  %v1071_v49 = vmul.f32 %v283_v35, %v283_v35  ;;  %v1072_v51 = vmul.f32 %v284_v36, %v284_v36  ;;  %p2013_p13 = scmp.lt.s32.totalorder %s2854_s28, %s2011_s26 }
  0x60   : > { %1804 = vmatprep.subr.bf16.mxu1 %v1771_v14  ;;  %v288_v40 = vld [vmem:[%s2304_s7 + $0x50] sm:$0xff]  ;;  %v289_v41 = vld [vmem:[%s2304_s7 + $0x58] sm:$0xff]  ;;  %v290_v42 = vld [vmem:[%s2304_s7 + $0x60] sm:$0xff]  ;;  %v1073_v52 = vmul.f32 %v285_v37, %v285_v37  ;;  %v1074_v54 = vmul.f32 %v286_v38, %v286_v38  ;;  %v1075_v55 = vmul.f32 %v287_v39, %v287_v39 }
  0x61   : > { %v291_v43 = vld [vmem:[%s2304_s7 + $0x68] sm:$0xff]  ;;  %v292_v44 = vld [vmem:[%s2304_s7 + $0x70] sm:$0xff]  ;;  %v293_v45 = vld [vmem:[%s2304_s7 + $0x78] sm:$0xff]  ;;  %v1858_v50 = vpack.c.bf16 %v1071_v49, %v1070_v48  ;;  %v1076_v57 = vmul.f32 %v288_v40, %v288_v40  ;;  %v1077_v58 = vmul.f32 %v289_v41, %v289_v41  ;;  %v1078_v60 = vmul.f32 %v290_v42, %v290_v42  ;;  %s2006_s7 = scalar_lea.vmem %s2854_s28, 2048 }
  0x62   : > { %v1861_v53 = vpack.c.bf16 %v1073_v52, %v1072_v51  ;;  %v1864_v56 = vpack.c.bf16 %v1075_v55, %v1074_v54  ;;  %v1079_v61 = vmul.f32 %v291_v43, %v291_v43  ;;  %v1080_v63 = vmul.f32 %v292_v44, %v292_v44  ;;  %p2007_p6 = scmp.ne.s32.totalorder %s2854_s28, %s2006_s7 }
  0x63   : > { %1770 = vmatpush3.bf16.xpose.msra.mxu0 %v1767_v5  ;;  %1806 = vmatpush3.bf16.msra.mxu1 %v1771_v14  ;;  %v1867_v59 = vpack.c.bf16 %v1077_v58, %v1076_v57  ;;  %v1081_v0 = vmul.f32 %v293_v45, %v293_v45  ;;  %v1425_v5 = vld [vmem:[%s2933_s2] ss:$0 sm:$0xff]  ;;  %v526_v54 = vlaneseq }
  0x64   : > { %1772 = vmatprep.subr.bf16.mxu0 %v1771_v14  ;;  %1808 = vmatprep.subr.bf16.mxu1 %v1775_v21  ;;  %v1870_v62 = vpack.c.bf16 %v1079_v61, %v1078_v60  ;;  %p2008_p8 = pnand %p2007_p6, %p2247_p12 }
  0x65   : > { %v1873_v1 = vpack.c.bf16 %v1081_v0, %v1080_v63  ;;  %v2412_v55 = vshrl.u32 %v526_v54, 7  ;;  %v2424_v0 = vand.u32 127, %v526_v54 }
  0x66   : > { %p2009_p10 = pneg %p2008_p8 }
  0x67   : > { %1810 = vmatpush3.bf16.msra.mxu1 %v1775_v21  ;;  %v1155_v58 = vadd.s32 8, %v2412_v55  ;;  %v1157_v60 = vadd.s32 24, %v2412_v55  ;;  %v1158_v61 = vadd.s32 32, %v2412_v55  ;;  %v1160_v63 = vadd.s32 48, %v2412_v55 }
  0x68   : > { %1812 = vmatprep.subr.bf16.mxu1 %v1779_v24 }
  0x6b   : > { %1774 = vmatpush3.bf16.xpose.msra.mxu0 %v1771_v14  ;;  %1814 = vmatpush3.bf16.msra.mxu1 %v1779_v24 }
  0x6c   : > { %1776 = vmatprep.subr.bf16.mxu0 %v1775_v21  ;;  %1816 = vmatprep.subr.bf16.mxu1 %v1783_v27 }
  0x6f   : > { %1818 = vmatpush3.bf16.msra.mxu1 %v1783_v27 }
  0x70   : > { %1820 = vmatprep.subr.bf16.mxu1 %v1787_v30 }
  0x73   : > { %1778 = vmatpush3.bf16.xpose.msra.mxu0 %v1775_v21  ;;  %1822 = vmatpush3.bf16.msra.mxu1 %v1787_v30 }
  0x74   : > { %1780 = vmatprep.subr.bf16.mxu0 %v1779_v24  ;;  %1824 = vmatprep.subr.bf16.mxu1 %v1791_v33 }
  0x77   : > { %1826 = vmatpush3.bf16.msra.mxu1 %v1791_v33 }
  0x78   : > { %1827 = vmatprep.subr.bf16.mxu1 %v2114_v46 }
  0x7b   : > { %1782 = vmatpush3.bf16.xpose.msra.mxu0 %v1779_v24 }
  0x7c   : > { %1784 = vmatprep.subr.bf16.mxu0 %v1783_v27 }
  0x83   : > { %1786 = vmatpush3.bf16.xpose.msra.mxu0 %v1783_v27 }
  0x84   : > { %1788 = vmatprep.subr.bf16.mxu0 %v1787_v30 }
  0x8b   : > { %1790 = vmatpush3.bf16.xpose.msra.mxu0 %v1787_v30 }
  0x8c   : > { %1792 = vmatprep.subr.bf16.mxu0 %v1791_v33 }
  0x93   : > { %1794 = vmatpush3.bf16.xpose.msra.mxu0 %v1791_v33 }
  0x94   : > { %1851 = vmatprep.subr.bf16.mxu0 %v2114_v46 }
  0x9a   : > { %1614 = vmatmul.mubr.f32.vlgmr.msra.gmra.mrb[0].mxu0 %v279_v9 }
  0x9b   : > { %1616 = vmatprep.mubr.f32.mxu0 %v280_v12  ;;  %1853 = vmatpush3.bf16.xpose.msra.mxu0 %v1852_v19 }
  0x9c   : > { %1854 = vmatprep.subr.bf16.mxu0 %v2114_v46 }
  0x9e   : > { %1617 = vmatmul.mubr.f32.gmra.mrb[2].mxu0 %v281_v13 }
  0x9f   : > { %1619 = vmatprep.mubr.f32.mxu0 %v282_v34 }
  0xa2   : > { %1620 = vmatmul.mubr.f32.gmra.mrb[4].mxu0 %v283_v35 }
  0xa3   : > { %1622 = vmatprep.mubr.f32.mxu0 %v284_v36  ;;  %1856 = vmatpush3.bf16.xpose.msra.mxu0 %v1855_v20 }
  0xa4   : > { %1857 = vmatprep.subr.bf16.mxu0 %v2114_v46 }
  0xa6   : > { %1623 = vmatmul.mubr.f32.gmra.mrb[6].mxu0 %v285_v37 }
  0xa7   : > { %1625 = vmatprep.mubr.f32.mxu0 %v286_v38 }
  0xaa   : > { %1626 = vmatmul.mubr.f32.gmra.mrb[8].mxu0 %v287_v39 }
  0xab   : > { %1628 = vmatprep.mubr.f32.mxu0 %v288_v40  ;;  %1859 = vmatpush3.bf16.xpose.msra.mxu0 %v1858_v50 }
  0xac   : > { %1860 = vmatprep.subr.bf16.mxu0 %v2114_v46 }
  0xae   : > { %1629 = vmatmul.mubr.f32.gmra.mrb[10].mxu0 %v289_v41 }
  0xaf   : > { %1631 = vmatprep.mubr.f32.mxu0 %v290_v42 }
  0xb2   : > { %1632 = vmatmul.mubr.f32.gmra.mrb[12].mxu0 %v291_v43 }
  0xb3   : > { %1634 = vmatprep.mubr.f32.mxu0 %v292_v44  ;;  %1862 = vmatpush3.bf16.xpose.msra.mxu0 %v1861_v53 }
  0xb4   : > { %1863 = vmatprep.subr.bf16.mxu0 %v2114_v46 }
  0xb6   : > { %1635 = vmatmul.mubr.f32.gmra.mrb[14].mxu0 %v293_v45 }
  0xb7   : > { %1760 = vmatprep.mubr.msk.f32.mxu0 %vm2115_vm0, %v2116_v47 }
  0xbb   : > { %1865 = vmatpush3.bf16.xpose.msra.mxu0 %v1864_v56  ;;  %v2414_v56 = vstv %s1474_s16  ;;  %s2012_s16 = scalar_lea.vmem %s2011_s26, 4096 }
  0xbc   : > { %1866 = vmatprep.subr.bf16.mxu0 %v2114_v46  ;;  %v1171_v57 = vadd.s32 %v2414_v56, %v2412_v55  ;;  %p2014_p3 = scmp.lt.s32.totalorder %s2012_s16, %s2006_s7 }
  0xbe   : > { %vm1187_vm1 = vcmp.lt.s32.totalorder %v1171_v57, 256  ;;  %p2015_p7 = por %p2014_p3, %p2013_p13 }
  0xc0   : > { %p2016_p9 = pnand %p2015_p7, %p2009_p10 }
  0xc3   : > { %1868 = vmatpush3.bf16.xpose.msra.mxu0 %v1867_v59  ;;  %v1156_v59 = vadd.s32 16, %v2412_v55 }
  0xc4   : > { %1869 = vmatprep.subr.bf16.mxu0 %v2114_v46 }
  0xcb   : > { %1871 = vmatpush3.bf16.xpose.msra.mxu0 %v1870_v62  ;;  %v1159_v62 = vadd.s32 40, %v2412_v55 }
  0xcc   : > { %1872 = vmatprep.subr.bf16.mxu0 %v2114_v46 }
  0xd3   : > { %1874 = vmatpush3.bf16.xpose.msra.mxu0 %v1873_v1  ;;  %v1172_v1 = vadd.s32 %v2414_v56, %v1155_v58 }
  0xd5   : > { %vm1188_vm3 = vcmp.lt.s32.totalorder %v1172_v1, 256 }
  0xda   : > { %1761 = vmatmul.mubr.f32.vlgmr.msra.gmra.mrb[16].mxu0 %v2117_v2 }
 0x16d   : > { %v1615_v3 = vpop.f32.mrb[0].mxu0 }
 0x16e   : > { %v377_v4 = vpop.f32.mrb[1].mxu0  ;;  %v457_v7 = vmul.f32 2.0, %v1615_v3  ;;  %v1173_v3 = vadd.s32 %v2414_v56, %v1156_v59  ;;  %v1166_v59 = vadd.s32 96, %v2412_v55 }
 0x16f   : > { %v456_v6 = vmul.f32 2.0, %v377_v4  ;;  %v1174_v4 = vadd.s32 %v2414_v56, %v1157_v60 }
 0x170   : > { %v2366_v14 = vsub.f32 %v1425_v5, %v457_v7  ;;  %v1162_v7 = vadd.s32 64, %v2412_v55  ;;  %vm1189_vm4 = vcmp.lt.s32.totalorder %v1173_v3, 256 }
 0x171   : > { %v1618_v8 = vpop.f32.mrb[2].mxu0  ;;  %v2363_v9 = vsub.f32 %v1425_v5, %v456_v6  ;;  %v1161_v6 = vadd.s32 56, %v2412_v55  ;;  %vm1190_vm5 = vcmp.lt.s32.totalorder %v1174_v4, 256 }
 0x172   : > { %v387_v10 = vpop.f32.mrb[3].mxu0  ;;  %v459_v11 = vmul.f32 2.0, %v1618_v8 }
 0x173   : > { %v458_v12 = vmul.f32 2.0, %v387_v10  ;;  %494 = vmin.xlane.f32.xlu0 %v2363_v9  ;;  %v1176_v10 = vadd.s32 %v2414_v56, %v1159_v62 }
 0x174   : > { %v2372_v19 = vsub.f32 %v1425_v5, %v459_v11  ;;  %v1177_v11 = vadd.s32 %v2414_v56, %v1160_v63 }
 0x175   : > { %v1621_v13 = vpop.f32.mrb[4].mxu0  ;;  %v2368_v15 = vsub.f32 %v1425_v5, %v458_v12  ;;  %vm1192_vm7 = vcmp.lt.s32.totalorder %v1176_v10, 256  ;;  %v1183_v10 = vadd.s32 %v2414_v56, %v1166_v59 }
 0x176   : > { %v397_v16 = vpop.f32.mrb[5].mxu0  ;;  %v461_v17 = vmul.f32 2.0, %v1621_v13  ;;  %vm1193_vm8 = vcmp.lt.s32.totalorder %v1177_v11, 256 }
 0x177   : > { %v460_v18 = vmul.f32 2.0, %v397_v16  ;;  %496 = vmin.xlane.f32.xlu0 %v2366_v14  ;;  %498 = vmin.xlane.f32.xlu1 %v2368_v15 }
 0x178   : > { %v2378_v25 = vsub.f32 %v1425_v5, %v461_v17  ;;  %v2440_v17 = vadd.s32 %v2414_v56, %v1161_v6 }
 0x179   : > { %v1624_v20 = vpop.f32.mrb[6].mxu0  ;;  %v2374_v21 = vsub.f32 %v1425_v5, %v460_v18  ;;  %v2443_v18 = vadd.s32 %v2414_v56, %v1162_v7 }
 0x17a   : > { %v407_v22 = vpop.f32.mrb[7].mxu0  ;;  %v463_v23 = vmul.f32 2.0, %v1624_v20  ;;  %vm1194_vm11 = vcmp.lt.s32.totalorder %v2440_v17, 256 }
 0x17b   : > { %v462_v24 = vmul.f32 2.0, %v407_v22  ;;  %500 = vmin.xlane.f32.xlu1 %v2372_v19  ;;  %502 = vmin.xlane.f32.xlu0 %v2374_v21  ;;  %vm1195_vm12 = vcmp.lt.s32.totalorder %v2443_v18, 256 }
 0x17c   : > { %v2384_v31 = vsub.f32 %v1425_v5, %v463_v23  ;;  %v1164_v23 = vadd.s32 80, %v2412_v55 }
 0x17d   : > { %v1627_v26 = vpop.f32.mrb[8].mxu0  ;;  %v2380_v27 = vsub.f32 %v1425_v5, %v462_v24 }
 0x17e   : > { %v417_v28 = vpop.f32.mrb[9].mxu0  ;;  %v465_v29 = vmul.f32 2.0, %v1627_v26 }
 0x17f   : > { %v464_v30 = vmul.f32 2.0, %v417_v28  ;;  %504 = vmin.xlane.f32.xlu1 %v2378_v25  ;;  %506 = vmin.xlane.f32.xlu0 %v2380_v27 }
 0x180   : > { %v2390_v37 = vsub.f32 %v1425_v5, %v465_v29 }
 0x181   : > { %v1630_v32 = vpop.f32.mrb[10].mxu0  ;;  %v2386_v33 = vsub.f32 %v1425_v5, %v464_v30 }
 0x182   : > { %v427_v34 = vpop.f32.mrb[11].mxu0  ;;  %v467_v35 = vmul.f32 2.0, %v1630_v32 }
 0x183   : > { %v466_v36 = vmul.f32 2.0, %v427_v34  ;;  %508 = vmin.xlane.f32.xlu1 %v2384_v31  ;;  %510 = vmin.xlane.f32.xlu0 %v2386_v33 }
 0x184   : > { %v2396_v43 = vsub.f32 %v1425_v5, %v467_v35 }
 0x185   : > { %v1633_v38 = vpop.f32.mrb[12].mxu0  ;;  %v2392_v39 = vsub.f32 %v1425_v5, %v466_v36 }
 0x186   : > { %v437_v40 = vpop.f32.mrb[13].mxu0  ;;  %v469_v41 = vmul.f32 2.0, %v1633_v38 }
 0x187   : > { %v468_v42 = vmul.f32 2.0, %v437_v40  ;;  %512 = vmin.xlane.f32.xlu1 %v2390_v37  ;;  %514 = vmin.xlane.f32.xlu0 %v2392_v39  ;;  %v2466_v40 = vadd.s32 %v2414_v56, %v1164_v23 }
 0x188   : > { %v2402_v51 = vsub.f32 %v1425_v5, %v469_v41  ;;  %v1165_v41 = vadd.s32 88, %v2412_v55 }
 0x189   : > { %v1636_v44 = vpop.f32.mrb[14].mxu0  ;;  %v2398_v45 = vsub.f32 %v1425_v5, %v468_v42 }
 0x18a   : > { %v447_v48 = vpop.f32.mrb[15].mxu0  ;;  %v471_v49 = vmul.f32 2.0, %v1636_v44  ;;  %v2490_v62 = vadd.s32 %v2414_v56, %v1165_v41 }
 0x18b   : > { %v470_v50 = vmul.f32 2.0, %v447_v48  ;;  %516 = vmin.xlane.f32.xlu1 %v2396_v43  ;;  %518 = vmin.xlane.f32.xlu0 %v2398_v45 }
 0x18c   : > { %v2408_v53 = vsub.f32 %v1425_v5, %v471_v49 }
 0x18d   : > { %v2404_v52 = vsub.f32 %v1425_v5, %v470_v50  ;;  %v1175_v5 = vadd.s32 %v2414_v56, %v1158_v61 }
 0x18f   : > { %520 = vmin.xlane.f32.xlu1 %v2402_v51  ;;  %522 = vmin.xlane.f32.xlu0 %v2404_v52  ;;  %vm1191_vm6 = vcmp.lt.s32.totalorder %v1175_v5, 256 }
 0x193   : > { %524 = vmin.xlane.f32.xlu1 %v2408_v53 }
 0x200   : > { %v495_v8 = vpop.xlane.xlu0 %494 }
 0x201   : > { %vm528_vm2 = vcmp.le.f32.partialorder %v2363_v9, %v495_v8  ;;  %v1203_v12 = vsel %vm1187_vm1, %v495_v8, 0.0  ;;  %v1163_v9 = vadd.s32 72, %v2412_v55  ;;  %vm1197_vm1 = vcmp.lt.s32.totalorder %v2466_v40, 256 }
 0x202   : > { %v2436_v13 = vsel %vm528_vm2, %v2424_v0, 128 }
 0x203   : > { %v561_v16 = vshra.s32 %v2436_v13, 16  ;;  %v2463_v38 = vadd.s32 %v2414_v56, %v1163_v9 }
 0x204   : > { %v497_v20 = vpop.xlane.xlu0 %496  ;;  %v499_v22 = vpop.xlane.xlu1 %498 }
 0x205   : > { %vm529_vm9 = vcmp.le.f32.partialorder %v2366_v14, %v497_v20  ;;  %v1204_v24 = vsel %vm1188_vm3, %v497_v20, 0.0  ;;  %vm530_vm10 = vcmp.le.f32.partialorder %v2368_v15, %v499_v22  ;;  %v1205_v26 = vsel %vm1189_vm4, %v499_v22, 0.0 }
 0x206   : > { %v2450_v28 = vsel %vm529_vm9, %v2424_v0, 128  ;;  %v1223_v29 = vadd.f32 %v1204_v24, %v1203_v12  ;;  %v2453_v30 = vsel %vm530_vm10, %v2424_v0, 128  ;;  %v2455_v32 = vcvt.s32.f32 %v561_v16 }
 0x207   : > { %v575_v34 = vshra.s32 %v2450_v28, 16  ;;  %v589_v35 = vshra.s32 %v2453_v30, 16  ;;  %vm1196_vm15 = vcmp.lt.s32.totalorder %v2463_v38, 256  ;;  %vm1198_vm4 = vcmp.lt.s32.totalorder %v2490_v62, 256 }
 0x208   : > { %v1224_v14 = vadd.f32 %v1223_v29, %v1205_v26  ;;  %564 = vmin.xlane.f32.xlu0 %v2455_v32  ;;  %v501_v15 = vpop.xlane.xlu1 %500  ;;  %v503_v36 = vpop.xlane.xlu0 %502  ;;  %v1167_v16 = vadd.s32 104, %v2412_v55  ;;  %v1168_v20 = vadd.s32 112, %v2412_v55 }
 0x209   : > { %vm531_vm13 = vcmp.le.f32.partialorder %v2372_v19, %v501_v15  ;;  %v1206_v42 = vsel %vm1190_vm5, %v501_v15, 0.0  ;;  %vm532_vm14 = vcmp.le.f32.partialorder %v2374_v21, %v503_v36  ;;  %v1207_v44 = vsel %vm1191_vm6, %v503_v36, 0.0 }
 0x20a   : > { %v2474_v48 = vsel %vm531_vm13, %v2424_v0, 128  ;;  %v1225_v49 = vadd.f32 %v1224_v14, %v1206_v42  ;;  %v2477_v50 = vsel %vm532_vm14, %v2424_v0, 128  ;;  %v2479_v54 = vcvt.s32.f32 %v575_v34 }
 0x20b   : > { %v2481_v57 = vcvt.s32.f32 %v589_v35  ;;  %v603_v58 = vshra.s32 %v2474_v48, 16  ;;  %v617_v19 = vshra.s32 %v2477_v50, 16  ;;  %v1184_v14 = vadd.s32 %v2414_v56, %v1167_v16 }
 0x20c   : > { %v1226_v21 = vadd.f32 %v1225_v49, %v1207_v44  ;;  %578 = vmin.xlane.f32.xlu1 %v2479_v54  ;;  %v505_v60 = vpop.xlane.xlu1 %504  ;;  %v507_v61 = vpop.xlane.xlu0 %506  ;;  %v1185_v15 = vadd.s32 %v2414_v56, %v1168_v20  ;;  %v1169_v36 = vadd.s32 120, %v2412_v55 }
 0x20d   : > { %592 = vmin.xlane.f32.xlu0 %v2481_v57  ;;  %vm533_vm2 = vcmp.le.f32.partialorder %v2378_v25, %v505_v60  ;;  %v1208_v63 = vsel %vm1192_vm7, %v505_v60, 0.0  ;;  %vm534_vm3 = vcmp.le.f32.partialorder %v2380_v27, %v507_v61  ;;  %v1209_v1 = vsel %vm1193_vm8, %v507_v61, 0.0 }
 0x20e   : > { %v2498_v3 = vsel %vm533_vm2, %v2424_v0, 128  ;;  %v1227_v4 = vadd.f32 %v1226_v21, %v1208_v63  ;;  %v2501_v5 = vsel %vm534_vm3, %v2424_v0, 128  ;;  %v2503_v6 = vcvt.s32.f32 %v603_v58 }
 0x20f   : > { %v2505_v7 = vcvt.s32.f32 %v617_v19  ;;  %v631_v8 = vshra.s32 %v2498_v3, 16  ;;  %v645_v25 = vshra.s32 %v2501_v5, 16  ;;  %vm1199_vm7 = vcmp.lt.s32.totalorder %v1183_v10, 256 }
 0x210   : > { %v1228_v27 = vadd.f32 %v1227_v4, %v1209_v1  ;;  %606 = vmin.xlane.f32.xlu1 %v2503_v6  ;;  %v509_v11 = vpop.xlane.xlu1 %508  ;;  %v511_v12 = vpop.xlane.xlu0 %510  ;;  %vm1200_vm10 = vcmp.lt.s32.totalorder %v1184_v14, 256  ;;  %v1186_v21 = vadd.s32 %v2414_v56, %v1169_v36 }
 0x211   : > { %620 = vmin.xlane.f32.xlu0 %v2505_v7  ;;  %vm535_vm5 = vcmp.le.f32.partialorder %v2384_v31, %v509_v11  ;;  %v1210_v22 = vsel %vm1194_vm11, %v509_v11, 0.0  ;;  %vm536_vm6 = vcmp.le.f32.partialorder %v2386_v33, %v511_v12  ;;  %v1211_v9 = vsel %vm1195_vm12, %v511_v12, 0.0 }
 0x212   : > { %v2522_v23 = vsel %vm535_vm5, %v2424_v0, 128  ;;  %v1229_v24 = vadd.f32 %v1228_v27, %v1210_v22  ;;  %v2525_v26 = vsel %vm536_vm6, %v2424_v0, 128  ;;  %v2527_v29 = vcvt.s32.f32 %v631_v8 }
 0x213   : > { %v2529_v34 = vcvt.s32.f32 %v645_v25  ;;  %v659_v31 = vshra.s32 %v2522_v23, 16  ;;  %v673_v17 = vshra.s32 %v2525_v26, 16  ;;  %vm1201_vm11 = vcmp.lt.s32.totalorder %v1185_v15, 256 }
 0x214   : > { %v1230_v33 = vadd.f32 %v1229_v24, %v1211_v9  ;;  %634 = vmin.xlane.f32.xlu1 %v2527_v29  ;;  %v513_v18 = vpop.xlane.xlu1 %512  ;;  %v515_v35 = vpop.xlane.xlu0 %514  ;;  %vm1202_vm14 = vcmp.lt.s32.totalorder %v1186_v21, 256 }
 0x215   : > { %648 = vmin.xlane.f32.xlu0 %v2529_v34  ;;  %vm537_vm8 = vcmp.le.f32.partialorder %v2390_v37, %v513_v18  ;;  %v1212_v41 = vsel %vm1196_vm15, %v513_v18, 0.0  ;;  %vm538_vm9 = vcmp.le.f32.partialorder %v2392_v39, %v515_v35  ;;  %v1213_v42 = vsel %vm1197_vm1, %v515_v35, 0.0 }
 0x216   : > { %v2545_v44 = vsel %vm537_vm8, %v2424_v0, 128  ;;  %v1231_v49 = vadd.f32 %v1230_v33, %v1212_v41  ;;  %v2548_v58 = vsel %vm538_vm9, %v2424_v0, 128  ;;  %v2550_v55 = vcvt.s32.f32 %v659_v31 }
 0x217   : > { %v2552_v19 = vcvt.s32.f32 %v673_v17  ;;  %v687_v37 = vshra.s32 %v2545_v44, 16  ;;  %v701_v38 = vshra.s32 %v2548_v58, 16 }
 0x218   : > { %v1232_v59 = vadd.f32 %v1231_v49, %v1213_v42  ;;  %662 = vmin.xlane.f32.xlu1 %v2550_v55  ;;  %v517_v39 = vpop.xlane.xlu1 %516  ;;  %v519_v40 = vpop.xlane.xlu0 %518  ;;  %v560_v42 = vand.u32 65535, %v2436_v13 }
 0x219   : > { %676 = vmin.xlane.f32.xlu0 %v2552_v19  ;;  %vm539_vm12 = vcmp.le.f32.partialorder %v2396_v43, %v517_v39  ;;  %v1214_v60 = vsel %vm1198_vm4, %v517_v39, 0.0  ;;  %vm540_vm13 = vcmp.le.f32.partialorder %v2398_v45, %v519_v40  ;;  %v1215_v61 = vsel %vm1199_vm7, %v519_v40, 0.0 }
 0x21a   : > { %v2565_v63 = vsel %vm539_vm12, %v2424_v0, 128  ;;  %v1233_v1 = vadd.f32 %v1232_v59, %v1214_v60  ;;  %v2568_v4 = vsel %vm540_vm13, %v2424_v0, 128  ;;  %v2570_v8 = vcvt.s32.f32 %v687_v37 }
 0x21b   : > { %v2572_v56 = vcvt.s32.f32 %v701_v38  ;;  %v715_v43 = vshra.s32 %v2565_v63, 16  ;;  %v729_v62 = vshra.s32 %v2568_v4, 16  ;;  %v562_v37 = vcvt.s32.f32 %v560_v42 }
 0x21c   : > { %v1234_v25 = vadd.f32 %v1233_v1, %v1215_v61  ;;  %690 = vmin.xlane.f32.xlu1 %v2570_v8  ;;  %v521_v45 = vpop.xlane.xlu1 %520  ;;  %v523_v10 = vpop.xlane.xlu0 %522  ;;  %v574_v38 = vand.u32 65535, %v2450_v28  ;;  %v588_v59 = vand.u32 65535, %v2453_v30  ;;  %v602_v60 = vand.u32 65535, %v2474_v48 }
 0x21d   : > { %704 = vmin.xlane.f32.xlu0 %v2572_v56  ;;  %vm541_vm15 = vcmp.le.f32.partialorder %v2402_v51, %v521_v45  ;;  %v1216_v27 = vsel %vm1200_vm10, %v521_v45, 0.0  ;;  %vm542_vm1 = vcmp.le.f32.partialorder %v2404_v52, %v523_v10  ;;  %v1217_v11 = vsel %vm1201_vm11, %v523_v10, 0.0 }
 0x21e   : > { %v2583_v12 = vsel %vm541_vm15, %v2424_v0, 128  ;;  %v1235_v16 = vadd.f32 %v1234_v25, %v1216_v27  ;;  %v2586_v20 = vsel %vm542_vm1, %v2424_v0, 128  ;;  %v2588_v22 = vcvt.s32.f32 %v715_v43 }
 0x21f   : > { %v2590_v9 = vcvt.s32.f32 %v729_v62  ;;  %v743_v24 = vshra.s32 %v2583_v12, 16  ;;  %v757_v51 = vshra.s32 %v2586_v20, 16  ;;  %v576_v21 = vcvt.s32.f32 %v574_v38 }
 0x220   : > { %v1236_v31 = vadd.f32 %v1235_v16, %v1217_v11  ;;  %718 = vmin.xlane.f32.xlu1 %v2588_v22  ;;  %v525_v52 = vpop.xlane.xlu1 %524  ;;  %v590_v13 = vcvt.s32.f32 %v588_v59  ;;  %v616_v28 = vand.u32 65535, %v2477_v50  ;;  %v604_v43 = vcvt.s32.f32 %v602_v60 }
 0x221   : > { %732 = vmin.xlane.f32.xlu0 %v2590_v9  ;;  %vm543_vm2 = vcmp.le.f32.partialorder %v2408_v53, %v525_v52  ;;  %v1218_v17 = vsel %vm1202_vm14, %v525_v52, 0.0  ;;  %v2598_v33 = vcvt.s32.f32 %v743_v24  ;;  %v2600_v18 = vcvt.s32.f32 %v757_v51  ;;  %v2613_v53 = vpop.f32.mrb[16].mxu0 }
 0x222   : > { %v2603_v35 = vsel %vm543_vm2, %v2424_v0, 128  ;;  %v2605_v14 = vadd.f32 %v1236_v31, %v1218_v17  ;;  %v1762_v41 = vpop.f32.mrb[17].mxu0  ;;  %v630_v48 = vand.u32 65535, %v2498_v3  ;;  %v644_v50 = vand.u32 65535, %v2501_v5 }
 0x223   : > { %v771_v15 = vshra.s32 %v2603_v35, 16  ;;  %v658_v3 = vand.u32 65535, %v2522_v23  ;;  %v672_v5 = vand.u32 65535, %v2525_v26  ;;  %v686_v23 = vand.u32 65535, %v2545_v44 }
 0x224   : > { %746 = vmin.xlane.f32.xlu1 %v2598_v33  ;;  %v632_v10 = vcvt.s32.f32 %v630_v48  ;;  %v700_v26 = vand.u32 65535, %v2548_v58  ;;  %v714_v44 = vand.u32 65535, %v2565_v63  ;;  %v728_v58 = vand.u32 65535, %v2568_v4 }
 0x225   : > { %760 = vmin.xlane.f32.xlu0 %v2600_v18  ;;  %v2610_v36 = vcvt.s32.f32 %v771_v15  ;;  %v660_v24 = vcvt.s32.f32 %v658_v3  ;;  %v688_v17 = vcvt.s32.f32 %v686_v23  ;;  %v742_v63 = vand.u32 65535, %v2583_v12 }
 0x226   : > { %v756_v4 = vand.u32 65535, %v2586_v20  ;;  %v770_v12 = vand.u32 65535, %v2603_v35 }
 0x228   : > { %774 = vmin.xlane.f32.xlu1 %v2610_v36 }
 0x295   : > { %v2616_v49 = vpop.xlane.xlu0 %564 }
 0x296   : > { %vm566_vm3 = vcmp.eq.f32.partialorder %v2455_v32, %v2616_v49 }
 0x297   : > { %v567_v39 = vsel %vm566_vm3, %v562_v37, inf  ;;  %v716_v37 = vcvt.s32.f32 %v714_v44  ;;  %vm1219_vm3 = vcmask 1040384  }
 0x298   : > { %568 = vmin.xlane.f32.xlu0 %v567_v39  ;;  %v1220_v35 = vsel %vm1219_vm3, %v2613_v53, 0.0 }
 0x299   : > { %v2622_v40 = vpop.xlane.xlu1 %578 }
 0x29a   : > { %v2625_v61 = vpop.xlane.xlu0 %592  ;;  %vm580_vm4 = vcmp.eq.f32.partialorder %v2479_v54, %v2622_v40  ;;  %v618_v54 = vcvt.s32.f32 %v616_v28  ;;  %v772_v28 = vcvt.s32.f32 %v770_v12 }
 0x29b   : > { %v581_v1 = vsel %vm580_vm4, %v576_v21, inf  ;;  %vm594_vm5 = vcmp.eq.f32.partialorder %v2481_v57, %v2625_v61  ;;  %v744_v21 = vcvt.s32.f32 %v742_v63 }
 0x29c   : > { %582 = vmin.xlane.f32.xlu1 %v581_v1  ;;  %v595_v30 = vsel %vm594_vm5, %v590_v13, inf }
 0x29d   : > { %596 = vmin.xlane.f32.xlu0 %v595_v30  ;;  %v2632_v32 = vpop.xlane.xlu1 %606 }
 0x29e   : > { %v2635_v62 = vpop.xlane.xlu0 %620  ;;  %vm608_vm6 = vcmp.eq.f32.partialorder %v2503_v6, %v2632_v32  ;;  %v646_v6 = vcvt.s32.f32 %v644_v50 }
 0x29f   : > { %v609_v25 = vsel %vm608_vm6, %v604_v43, inf  ;;  %vm622_vm7 = vcmp.eq.f32.partialorder %v2505_v7, %v2635_v62 }
 0x2a0   : > { %610 = vmin.xlane.f32.xlu1 %v609_v25  ;;  %v623_v57 = vsel %vm622_vm7, %v618_v54, inf  ;;  %v599_v54 = vcvt.f32.s32 %v2625_v61 }
 0x2a1   : > { %624 = vmin.xlane.f32.xlu0 %v623_v57  ;;  %v2642_v45 = vpop.xlane.xlu1 %634 }
 0x2a2   : > { %v2645_v27 = vpop.xlane.xlu0 %648  ;;  %vm636_vm8 = vcmp.eq.f32.partialorder %v2527_v29, %v2642_v45  ;;  %v674_v29 = vcvt.s32.f32 %v672_v5  ;;  %v600_v53 = vshll.u32 %v599_v54, 16 }
 0x2a3   : > { %v637_v11 = vsel %vm636_vm8, %v632_v10, inf  ;;  %vm650_vm9 = vcmp.eq.f32.partialorder %v2529_v34, %v2645_v27  ;;  %v613_v10 = vcvt.f32.s32 %v2632_v32 }
 0x2a4   : > { %638 = vmin.xlane.f32.xlu1 %v637_v11  ;;  %v651_v7 = vsel %vm650_vm9, %v646_v6, inf  ;;  %v627_v6 = vcvt.f32.s32 %v2635_v62 }
 0x2a5   : > { %652 = vmin.xlane.f32.xlu0 %v651_v7  ;;  %v2652_v16 = vpop.xlane.xlu1 %662  ;;  %v614_v11 = vshll.u32 %v613_v10, 16  ;;  %v641_v7 = vcvt.f32.s32 %v2642_v45  ;;  %v2118_v45 = vmov 1.0|1.0  }
 0x2a6   : > { %v2655_v51 = vpop.xlane.xlu0 %676  ;;  %vm664_vm10 = vcmp.eq.f32.partialorder %v2550_v55, %v2652_v16  ;;  %v702_v55 = vcvt.s32.f32 %v700_v26  ;;  %v628_v23 = vshll.u32 %v627_v6, 16  ;;  %v669_v44 = vcvt.f32.s32 %v2652_v16 }
 0x2a7   : > { %v665_v31 = vsel %vm664_vm10, %v660_v24, inf  ;;  %vm678_vm11 = vcmp.eq.f32.partialorder %v2552_v19, %v2655_v51 }
 0x2a8   : > { %666 = vmin.xlane.f32.xlu1 %v665_v31  ;;  %v679_v34 = vsel %vm678_vm11, %v674_v29, inf  ;;  %v655_v29 = vcvt.f32.s32 %v2645_v27  ;;  %v1238_v31 = vrot.slane %v2605_v14, 4 }
 0x2a9   : > { %680 = vmin.xlane.f32.xlu0 %v679_v34  ;;  %v2662_v52 = vpop.xlane.xlu1 %690 }
 0x2aa   : > { %v2665_v15 = vpop.xlane.xlu0 %704  ;;  %vm692_vm12 = vcmp.eq.f32.partialorder %v2570_v8, %v2662_v52  ;;  %v730_v8 = vcvt.s32.f32 %v728_v58  ;;  %v1239_v16 = vadd.f32 %v1238_v31, %v2605_v14 }
 0x2ab   : > { %v693_v41 = vsel %vm692_vm12, %v688_v17, inf  ;;  %vm706_vm13 = vcmp.eq.f32.partialorder %v2572_v56, %v2665_v15  ;;  %v642_v17 = vshll.u32 %v641_v7, 16 }
 0x2ac   : > { %694 = vmin.xlane.f32.xlu1 %v693_v41  ;;  %v707_v19 = vsel %vm706_vm13, %v702_v55, inf  ;;  %v656_v41 = vshll.u32 %v655_v29, 16 }
 0x2ad   : > { %708 = vmin.xlane.f32.xlu0 %v707_v19  ;;  %v2672_v42 = vpop.xlane.xlu1 %718  ;;  %v683_v19 = vcvt.f32.s32 %v2655_v51 }
 0x2ae   : > { %v2675_v38 = vpop.xlane.xlu0 %732  ;;  %vm720_vm14 = vcmp.eq.f32.partialorder %v2588_v22, %v2672_v42  ;;  %v758_v22 = vcvt.s32.f32 %v756_v4 }
 0x2af   : > { %v721_v59 = vsel %vm720_vm14, %v716_v37, inf  ;;  %vm734_vm15 = vcmp.eq.f32.partialorder %v2590_v9, %v2675_v38 }
 0x2b0   : > { %722 = vmin.xlane.f32.xlu1 %v721_v59  ;;  %v735_v56 = vsel %vm734_vm15, %v730_v8, inf  ;;  %v670_v59 = vshll.u32 %v669_v44, 16 }
 0x2b1   : > { %736 = vmin.xlane.f32.xlu0 %v735_v56  ;;  %v2682_v39 = vpop.xlane.xlu1 %746  ;;  %v697_v56 = vcvt.f32.s32 %v2662_v52 }
 0x2b2   : > { %v2685_v60 = vpop.xlane.xlu0 %760  ;;  %vm748_vm1 = vcmp.eq.f32.partialorder %v2598_v33, %v2682_v39  ;;  %v571_v33 = vcvt.f32.s32 %v2616_v49 }
 0x2b3   : > { %v749_v13 = vsel %vm748_vm1, %v744_v21, inf  ;;  %vm762_vm2 = vcmp.eq.f32.partialorder %v2600_v18, %v2685_v60  ;;  %v585_v18 = vcvt.f32.s32 %v2622_v40 }
 0x2b4   : > { %750 = vmin.xlane.f32.xlu1 %v749_v13  ;;  %v763_v20 = vsel %vm762_vm2, %v758_v22, inf  ;;  %v572_v43 = vshll.u32 %v571_v33, 16  ;;  %v684_v22 = vshll.u32 %v683_v19, 16  ;;  %v711_v13 = vcvt.f32.s32 %v2665_v15 }
 0x2b5   : > { %764 = vmin.xlane.f32.xlu0 %v763_v20  ;;  %v2691_v9 = vpop.xlane.xlu1 %774  ;;  %v586_v57 = vshll.u32 %v585_v18, 16  ;;  %v725_v33 = vcvt.f32.s32 %v2672_v42 }
 0x2b6   : > { %vm776_vm4 = vcmp.eq.f32.partialorder %v2610_v36, %v2691_v9  ;;  %v712_v18 = vshll.u32 %v711_v13, 16 }
 0x2b7   : > { %v777_v1 = vsel %vm776_vm4, %v772_v28, inf }
 0x2b8   : > { %778 = vmin.xlane.f32.xlu1 %v777_v1  ;;  %v698_v1 = vshll.u32 %v697_v56, 16 }
 0x2b9   : > { %1221 = vadd.xlane.f32.xlu0 %v1220_v35  ;;  %v1240_v35 = vrot.slane %v1239_v16, 2 }
 0x2bb   : > { %v1241_v10 = vadd.f32 %v1240_v35, %v1239_v16 }
 0x325   : > { %v569_v30 = vpop.xlane.xlu0 %568 }
 0x326   : > { %v570_v48 = vcvt.f32.s32 %v569_v30 }
 0x328   : > { %v573_v50 = vadd.s32 %v572_v43, %v570_v48  ;;  %v739_v48 = vcvt.f32.s32 %v2675_v38  ;;  %v726_v38 = vshll.u32 %v725_v33, 16 }
 0x329   : > { %v583_v25 = vpop.xlane.xlu1 %582 }
 0x32a   : > { %v584_v36 = vcvt.f32.s32 %v583_v25  ;;  %v597_v3 = vpop.xlane.xlu0 %596  ;;  %vm784_vm5 = vcmp.eq.s32.totalorder %v2424_v0, %v573_v50  ;;  %v740_v6 = vshll.u32 %v739_v48, 16 }
 0x32b   : > { %v598_v49 = vcvt.f32.s32 %v597_v3  ;;  %1669 = vmatprep.mubr.msk.f32.mxu1 %vm784_vm5, %v2117_v2 }
 0x32c   : > { %v587_v40 = vadd.s32 %v586_v57, %v584_v36  ;;  %v753_v36 = vcvt.f32.s32 %v2682_v39 }
 0x32d   : > { %v601_v5 = vadd.s32 %v600_v53, %v598_v49  ;;  %v611_v61 = vpop.xlane.xlu1 %610  ;;  %v767_v49 = vcvt.f32.s32 %v2685_v60 }
 0x32e   : > { %vm785_vm6 = vcmp.eq.s32.totalorder %v2424_v0, %v587_v40  ;;  %v612_v32 = vcvt.f32.s32 %v611_v61  ;;  %v625_v24 = vpop.xlane.xlu0 %624  ;;  %v754_v7 = vshll.u32 %v753_v36, 16 }
 0x32f   : > { %vm1828_vm7 = vmpackc.low %vm785_vm6, %vm784_vm5  ;;  %v626_v62 = vcvt.f32.s32 %v625_v24  ;;  %1670 = vmatmul.mubr.msk.f32.vlgmr.msra.gmra.mrb[0].mxu1 %vm785_vm6, %v2117_v2  ;;  %vm786_vm8 = vcmp.eq.s32.totalorder %v2424_v0, %v601_v5  ;;  %v768_v29 = vshll.u32 %v767_v49, 16 }
 0x330   : > { %v615_v26 = vadd.s32 %v614_v11, %v612_v32  ;;  %1672 = vmatprep.mubr.msk.f32.mxu1 %vm786_vm8, %v2117_v2  ;;  %1829 = vmatpush3.bf16.xpose.msk.msra.mxu1 %vm1828_vm7, %v2118_v45  ;;  %v1242_v11 = vrot.slane %v1241_v10, 1  ;;  %v781_v32 = vcvt.f32.s32 %v2691_v9 }
 0x331   : > { %v629_v34 = vadd.s32 %v628_v23, %v626_v62  ;;  %v639_v27 = vpop.xlane.xlu1 %638  ;;  %1830 = vmatprep.subr.bf16.mxu1 %v2114_v46 }
 0x332   : > { %v640_v55 = vcvt.f32.s32 %v639_v27  ;;  %v653_v58 = vpop.xlane.xlu0 %652  ;;  %vm787_vm9 = vcmp.eq.s32.totalorder %v2424_v0, %v615_v26  ;;  %v1243_v27 = vadd.f32 %v1242_v11, %v1241_v10 }
 0x333   : > { %v654_v37 = vcvt.f32.s32 %v653_v58  ;;  %1673 = vmatmul.mubr.msk.f32.gmra.mrb[2].mxu1 %vm787_vm9, %v2117_v2  ;;  %vm2724_vm10 = vmpackc.low %vm787_vm9, %vm786_vm8  ;;  %vm788_vm11 = vcmp.eq.s32.totalorder %v2424_v0, %v629_v34  ;;  %vm1245_vm9 = vcmask 0  }
 0x334   : > { %v643_v8 = vadd.s32 %v642_v17, %v640_v55  ;;  %1675 = vmatprep.mubr.msk.f32.mxu1 %vm788_vm11, %v2117_v2  ;;  %v782_v17 = vshll.u32 %v781_v32, 16 }
 0x335   : > { %v657_v4 = vadd.s32 %v656_v41, %v654_v37  ;;  %v667_v51 = vpop.xlane.xlu1 %666 }
 0x336   : > { %v668_v21 = vcvt.f32.s32 %v667_v51  ;;  %v681_v12 = vpop.xlane.xlu0 %680  ;;  %vm789_vm12 = vcmp.eq.s32.totalorder %v2424_v0, %v643_v8 }
 0x337   : > { %v682_v20 = vcvt.f32.s32 %v681_v12  ;;  %1676 = vmatmul.mubr.msk.f32.gmra.mrb[4].mxu1 %vm789_vm12, %v2117_v2  ;;  %vm2739_vm13 = vmpackc.low %vm789_vm12, %vm788_vm11  ;;  %vm790_vm14 = vcmp.eq.s32.totalorder %v2424_v0, %v657_v4 }
 0x338   : > { %v671_v14 = vadd.s32 %v670_v59, %v668_v21  ;;  %1678 = vmatprep.mubr.msk.f32.mxu1 %vm790_vm14, %v2117_v2  ;;  %1832 = vmatpush3.bf16.xpose.msk.msra.mxu1 %vm2724_vm10, %v2118_v45 }
 0x339   : > { %v685_v52 = vadd.s32 %v684_v22, %v682_v20  ;;  %v695_v15 = vpop.xlane.xlu1 %694  ;;  %1833 = vmatprep.subr.bf16.mxu1 %v2114_v46 }
 0x33a   : > { %v696_v30 = vcvt.f32.s32 %v695_v15  ;;  %v709_v43 = vpop.xlane.xlu0 %708  ;;  %vm791_vm15 = vcmp.eq.s32.totalorder %v2424_v0, %v671_v14 }
 0x33b   : > { %v710_v54 = vcvt.f32.s32 %v709_v43  ;;  %1679 = vmatmul.mubr.msk.f32.gmra.mrb[6].mxu1 %vm791_vm15, %v2117_v2  ;;  %vm2757_vm1 = vmpackc.low %vm791_vm15, %vm790_vm14  ;;  %vm792_vm2 = vcmp.eq.s32.totalorder %v2424_v0, %v685_v52 }
 0x33c   : > { %v699_v42 = vadd.s32 %v698_v1, %v696_v30  ;;  %1681 = vmatprep.mubr.msk.f32.mxu1 %vm792_vm2, %v2117_v2 }
 0x33d   : > { %v713_v25 = vadd.s32 %v712_v18, %v710_v54  ;;  %v723_v57 = vpop.xlane.xlu1 %722 }
 0x33e   : > { %v724_v3 = vcvt.f32.s32 %v723_v57  ;;  %v737_v53 = vpop.xlane.xlu0 %736  ;;  %vm793_vm3 = vcmp.eq.s32.totalorder %v2424_v0, %v699_v42 }
 0x33f   : > { %v738_v40 = vcvt.f32.s32 %v737_v53  ;;  %1682 = vmatmul.mubr.msk.f32.gmra.mrb[8].mxu1 %vm793_vm3, %v2117_v2  ;;  %vm2772_vm4 = vmpackc.low %vm793_vm3, %vm792_vm2  ;;  %vm794_vm5 = vcmp.eq.s32.totalorder %v2424_v0, %v713_v25 }
 0x340   : > { %v727_v39 = vadd.s32 %v726_v38, %v724_v3  ;;  %1684 = vmatprep.mubr.msk.f32.mxu1 %vm794_vm5, %v2117_v2  ;;  %1835 = vmatpush3.bf16.xpose.msk.msra.mxu1 %vm2739_vm13, %v2118_v45 }
 0x341   : > { %v741_v60 = vadd.s32 %v740_v6, %v738_v40  ;;  %v751_v61 = vpop.xlane.xlu1 %750  ;;  %1836 = vmatprep.subr.bf16.mxu1 %v2114_v46 }
 0x342   : > { %v752_v24 = vcvt.f32.s32 %v751_v61  ;;  %v765_v23 = vpop.xlane.xlu0 %764  ;;  %vm795_vm6 = vcmp.eq.s32.totalorder %v2424_v0, %v727_v39 }
 0x343   : > { %v766_v62 = vcvt.f32.s32 %v765_v23  ;;  %1685 = vmatmul.mubr.msk.f32.gmra.mrb[10].mxu1 %vm795_vm6, %v2117_v2  ;;  %vm2792_vm7 = vmpackc.low %vm795_vm6, %vm794_vm5  ;;  %vm796_vm8 = vcmp.eq.s32.totalorder %v2424_v0, %v741_v60 }
 0x344   : > { %v755_v31 = vadd.s32 %v754_v7, %v752_v24  ;;  %1687 = vmatprep.mubr.msk.f32.mxu1 %vm796_vm8, %v2117_v2 }
 0x345   : > { %v769_v9 = vadd.s32 %v768_v29, %v766_v62  ;;  %v779_v34 = vpop.xlane.xlu1 %778 }
 0x346   : > { %v780_v44 = vcvt.f32.s32 %v779_v34  ;;  %v1222_v55 = vpop.xlane.xlu0 %1221  ;;  %vm797_vm10 = vcmp.eq.s32.totalorder %v2424_v0, %v755_v31 }
 0x347   : > { %v1244_v58 = vadd.f32 %v1243_v27, %v1222_v55  ;;  %1688 = vmatmul.mubr.msk.f32.gmra.mrb[12].mxu1 %vm797_vm10, %v2117_v2  ;;  %vm1846_vm11 = vmpackc.low %vm797_vm10, %vm796_vm8  ;;  %vm798_vm12 = vcmp.eq.s32.totalorder %v2424_v0, %v769_v9 }
 0x348   : > { %v783_v41 = vadd.s32 %v782_v17, %v780_v44  ;;  %1690 = vmatprep.mubr.msk.f32.mxu1 %vm798_vm12, %v2117_v2  ;;  %1838 = vmatpush3.bf16.xpose.msk.msra.mxu1 %vm2757_vm1, %v2118_v45 }
 0x349   : > { %1246 = vst.msk [vmem:[%s277_s15] sm:$0x1] %vm1245_vm9, %v1244_v58  ;;  %1839 = vmatprep.subr.bf16.mxu1 %v2114_v46 }
 0x34a   : > { %vm799_vm13 = vcmp.eq.s32.totalorder %v2424_v0, %v783_v41 }
 0x34b   : > { %1691 = vmatmul.mubr.msk.f32.gmra.mrb[14].mxu1 %vm799_vm13, %v2117_v2  ;;  %vm1849_vm14 = vmpackc.low %vm799_vm13, %vm798_vm12 }
 0x34c   : > { %1725 = vmatprep.mubr.msk.f32.mxu1 %vm2115_vm0, %v2116_v47  ;;  %v993_v47 = vcvt.s32.f32 %v2424_v0 }
 0x350   : > { %1841 = vmatpush3.bf16.xpose.msk.msra.mxu1 %vm2772_vm4, %v2118_v45 }
 0x351   : > { %1842 = vmatprep.subr.bf16.mxu1 %v2114_v46 }
 0x358   : > { %1844 = vmatpush3.bf16.xpose.msk.msra.mxu1 %vm2792_vm7, %v2118_v45 }
 0x359   : > { %1845 = vmatprep.subr.bf16.mxu1 %v2114_v46 }
 0x360   : > { %1847 = vmatpush3.bf16.xpose.msk.msra.mxu1 %vm1846_vm11, %v2118_v45 }
 0x361   : > { %1848 = vmatprep.subr.bf16.mxu1 %v2114_v46 }
 0x368   : > { %1850 = vmatpush3.bf16.xpose.msk.msra.mxu1 %vm1849_vm14, %v2118_v45 }
 0x36f   : > { %1726 = vmatmul.mubr.f32.vlgmr.msra.gmra.mrb[16].mxu1 %v993_v47 }
 0x402   : > { %v1671_v2 = vpop.f32.mrb[0].mxu1 }
 0x403   : > { %978 = vst [vmem:[%s2831_s13 + $0x8] sm:$0xff] %v1671_v2  ;;  %v898_v46 = vpop.f32.mrb[1].mxu1 }
 0x404   : > { %977 = vst [vmem:[%s2831_s13] sm:$0xff] %v898_v46 }
 0x406   : > { %v1674_v45 = vpop.f32.mrb[2].mxu1 }
 0x407   : > { %980 = vst [vmem:[%s2831_s13 + $0x18] sm:$0xff] %v1674_v45  ;;  %v908_v0 = vpop.f32.mrb[3].mxu1 }
 0x408   : > { %979 = vst [vmem:[%s2831_s13 + $0x10] sm:$0xff] %v908_v0 }
 0x40a   : > { %v1677_v19 = vpop.f32.mrb[4].mxu1 }
 0x40b   : > { %982 = vst [vmem:[%s2831_s13 + $0x28] sm:$0xff] %v1677_v19  ;;  %v918_v37 = vpop.f32.mrb[5].mxu1 }
 0x40c   : > { %981 = vst [vmem:[%s2831_s13 + $0x20] sm:$0xff] %v918_v37 }
 0x40e   : > { %v1680_v63 = vpop.f32.mrb[6].mxu1 }
 0x40f   : > { %984 = vst [vmem:[%s2831_s13 + $0x38] sm:$0xff] %v1680_v63  ;;  %v928_v8 = vpop.f32.mrb[7].mxu1 }
 0x410   : > { %983 = vst [vmem:[%s2831_s13 + $0x30] sm:$0xff] %v928_v8 }
 0x412   : > { %v1683_v16 = vpop.f32.mrb[8].mxu1 }
 0x413   : > { %986 = vst [vmem:[%s2831_s13 + $0x48] sm:$0xff] %v1683_v16  ;;  %v938_v4 = vpop.f32.mrb[9].mxu1 }
 0x414   : > { %985 = vst [vmem:[%s2831_s13 + $0x40] sm:$0xff] %v938_v4 }
 0x416   : > { %v1686_v51 = vpop.f32.mrb[10].mxu1 }
 0x417   : > { %988 = vst [vmem:[%s2831_s13 + $0x58] sm:$0xff] %v1686_v51  ;;  %v948_v59 = vpop.f32.mrb[11].mxu1 }
 0x418   : > { %987 = vst [vmem:[%s2831_s13 + $0x50] sm:$0xff] %v948_v59 }
 0x41a   : > { %v1689_v56 = vpop.f32.mrb[12].mxu1 }
 0x41b   : > { %990 = vst [vmem:[%s2831_s13 + $0x68] sm:$0xff] %v1689_v56  ;;  %v958_v21 = vpop.f32.mrb[13].mxu1 }
 0x41c   : > { %989 = vst [vmem:[%s2831_s13 + $0x60] sm:$0xff] %v958_v21 }
 0x41e   : > { %v1692_v12 = vpop.f32.mrb[14].mxu1 }
 0x41f   : > { %992 = vst [vmem:[%s2831_s13 + $0x78] sm:$0xff] %v1692_v12  ;;  %v968_v22 = vpop.f32.mrb[15].mxu1 }
 0x420   : > { %991 = vst [vmem:[%s2831_s13 + $0x70] sm:$0xff] %v968_v22 }
 0x421   : > { %2019 = shalt.err (!%p2016_p9)
}
 0x422   : > { %s2020_s17 = scalar_lea.hbm %s2852_s11, 2048  ;;  %s2024_s15 = scalar_lea.hbm %s2934_s3, 4096 }
 0x423   : > { %p2021_p1 = scmp.ne.s32.totalorder %s2852_s11, %s2020_s17  ;;  %p2025_p11 = scmp.lt.u32.totalorder %s2852_s11, %s2934_s3 }
 0x424   : > { %p2026_p2 = scmp.lt.u32.totalorder %s2024_s15, %s2020_s17  ;;  %p2028_p6 = scmp.lt.u32.totalorder %s2020_s17, %s2852_s11 }
 0x425   : > { %p2022_p0 = pnand %p2021_p1, %p2247_p12 }
 0x426   : > { %p2027_p4 = por %p2026_p2, %p2025_p11 }
 0x427   : > { %p2023_p5 = pneg %p2022_p0 }
 0x428   : > { %p2029_p8 = por %p2028_p6, %p2027_p4 }
 0x42a   : > { %p2030_p10 = pnand %p2029_p8, %p2023_p5 }
 0x42c   : > { %2033 = shalt.err (!%p2030_p10)
}
 0x42d   : > { %s2120_s27 = smov 128   ;;  %s2121_s10 = smov 8  }
 0x42e   : > { %1883 = dma.vmem_to_hbm [thread:$0]  (%p2247_p12), %s2854_s28, 2048, %s2852_s11, %s1248_s12, %s2120_s27, %s2120_s27, %s2121_s10  }
 0x42f   : > { %s1478_s7 = sshll.u32 %s2174_s22, 4  ;;  %s267_s24 = scalar_lea.vmem [#allocation8], %s2298_s23 }
 0x430   : > { %s1284_s26 = sshll.u32 %s267_s24, 4  ;;  %s2887_s14 = scalar_lea.hbm %s2935_s4, %s1478_s7  ;;  %s2889_s26 = int_to_ptr.vmem [resolvable:$true] %s1284_s26 }
 0x431   : > { %s1253_s6 = scalar_lea.sflag [#allocation9], %s2298_s23  ;;  %s2034_s28 = scalar_lea.vmem %s2889_s26, 16 }
 0x432   : > { %p2035_p13 = scmp.ne.s32.totalorder %s2889_s26, %s2034_s28  ;;  %s2122_s22 = smov [#allocation8]  }
 0x433   : > { %s2038_s11 = sshll.u32 %s2122_s22, 4  ;;  %s2039_s11 = int_to_ptr.vmem [resolvable:$false] %s2038_s11 }
 0x434   : > { %p2036_p3 = pnand %p2035_p13, %p2247_p12  ;;  %s2040_s12 = scalar_lea.vmem %s2039_s11, 32 }
 0x435   : > { %p2041_p9 = scmp.lt.s32.totalorder %s2889_s26, %s2039_s11  ;;  %p2042_p1 = scmp.lt.s32.totalorder %s2040_s12, %s2034_s28 }
 0x436   : > { %p2037_p7 = pneg %p2036_p3 }
 0x437   : > { %p2043_p0 = por %p2042_p1, %p2041_p9 }
 0x439   : > { %p2044_p5 = pnand %p2043_p0, %p2037_p7 }
 0x442   : > { %v1060_v13 = vpop.f32.mrb[16].mxu1 }
 0x443   : > { %v1875_v20 = vtrunc.f32 %v1060_v13  ;;  %v1727_v28 = vpop.f32.mrb[17].mxu1 }
 0x445   : > { %v1876_v14 = vcvt.f32.s32 %v1875_v20 }
 0x447   : > { %1065 = vst [vmem:[%s267_s24] sm:$0x1] %v1876_v14 }
 0x448   : > { %2047 = shalt.err (!%p2044_p5)
}
 0x449   : > { %s2048_s23 = scalar_lea.hbm %s2887_s14, 16  ;;  %s2052_s29 = scalar_lea.hbm %s2935_s4, 32 }
 0x44a   : > { %p2049_p11 = scmp.ne.s32.totalorder %s2887_s14, %s2048_s23  ;;  %p2053_p6 = scmp.lt.u32.totalorder %s2887_s14, %s2935_s4 }
 0x44b   : > { %p2054_p8 = scmp.lt.u32.totalorder %s2052_s29, %s2048_s23  ;;  %p2056_p13 = scmp.lt.u32.totalorder %s2048_s23, %s2887_s14 }
 0x44c   : > { %p2050_p2 = pnand %p2049_p11, %p2247_p12 }
 0x44d   : > { %p2055_p10 = por %p2054_p8, %p2053_p6 }
 0x44e   : > { %p2051_p4 = pneg %p2050_p2 }
 0x44f   : > { %p2057_p3 = por %p2056_p13, %p2055_p10 }
 0x451   : > { %p2058_p7 = pnand %p2057_p3, %p2051_p4 }
 0x453   : > { %2061 = shalt.err (!%p2058_p7)
}
 0x454   : > { %1884 = dma.vmem_to_hbm [thread:$0]  (%p2247_p12), %s2889_s26, 16, %s2887_s14, %s1253_s6  }
 0x455 PF: > { %s1299_s7 = sand.u32 1, %s2096_s18   ;;  %p2961_p9 = scmp.ne.s32.totalorder %s2941_s25, 0 }
 0x456   : > { %p2962_p1 = scmp.ge.s32.totalorder %s2108_s21, 2  ;;  %s1300_s24 = scalar_lea.sflag [#allocation4], %s1299_s7 }
 0x458   : > { %p1896_p0 = pnand %p2962_p1, %p2961_p9 }
 0x45a   : > { %2087 = dma.done.wait (!%p1896_p0), %s1300_s24, 2048  }
 0x45b   : > { %2089 = vsyncadd (!%p1896_p0), %s1300_s24, 4294965248  ;;  %s1309_s16 = scalar_lea.sflag [#allocation9], %s1299_s7 }
 0x45c   : > { %2091 = dma.done.wait (!%p1896_p0), %s1309_s16, 16  }
 0x45d   : > { %2093 = vsyncadd (!%p1896_p0), %s1309_s16, 4294967280  ;;  %p23_p12 = scmp.ge.s32.totalorder %s2209_s30, 4   ;;  %s2963_s18 = smov %s2100_s19 }
 0x45e   : > { %s2964_s19 = smov %s2104_s20  ;;  %s2965_s20 = smov %s2243_s8 }
 0x45f   : > { %s2966_s21 = smov %s2209_s30  ;;  %25 = sbr.rel (!%p23_p12) target bundleno = 8 (0x8), region = 110 }
 0x466   :  { %1319 = vsyncpa [#allocation3], 1 }
 0x467   :  { %1321 = vsyncpa [#allocation3 + $0x1], 1 }
 0x468   :  { %1322 = vsyncpa [#allocation6], 1 }
 0x469   :  { %1323 = vsyncpa [#allocation4], 1 }
 0x46a   :  { %1325 = vsyncpa [#allocation4 + $0x1], 1 }
 0x46b   :  { %1326 = vsyncpa [#allocation9], 1 }
 0x46c   :  { %1328 = vsyncpa [#allocation9 + $0x1], 1 }

</bundles_post_ra>
